<compile_context>
chip_gen: v7x
topology: tpu7x:2x2x1
jax: 0.10.0
libtpu: 0.0.40
codegen_flags: <defaults>
</compile_context>

<pallas_src>
import jax
import jax.numpy as jnp
from jax.experimental import pallas as pl
from jax.experimental.pallas import tpu as pltpu

EXPANSION = 4
BN_EPS = 1e-5
_LANE = 128


def _round_up(v, m):
    return (v + m - 1) // m * m


def _largest_divisor_leq(n, cap):
    for d in range(min(n, cap), 0, -1):
        if n % d == 0:
            return d
    return 1


def _bottleneck_kernel(xp_hbm, w1_ref, w2k_ref, w3_ref, b1_ref, b2_ref, b3_ref,
                       o_ref, xbuf, dma_sem, t1_ref, acc_ref):
    """One (row-group, batch, row-tile) per grid step.

    xp_hbm : (N, H+2, W, Cp) bf16 in HBM (zero halo row top/bottom, padded channels)
    w1_ref : (Cp, Pp) bf16        1x1 conv, BN1 scale folded in
    w2k_ref: (3, 3*Pp, Pp) bf16   3x3 conv; rows [dx*Pp:(dx+1)*Pp] of w2k[dy] = tap (dy,dx)
    w3_ref : (Pp, Cp) bf16        1x1 expansion conv, BN3 scale folded in
    b*_ref : (1, Pp/Cp) f32       folded BN biases
    o_ref  : (1, TH, W, Cp) bf16  output row tile
    xbuf   : (2, TH+2, W, Cp) bf16 VMEM double buffer for the input slab
    dma_sem: (2,) DMA semaphores
    t1_ref : (TH+2, W, 3*Pp) bf16 VMEM scratch: K-stacked taps [left|center|right]
    acc_ref: (TH*W, Pp) f32       VMEM scratch: conv2 accumulator
    """
    _, TH, W, Cp = o_ref.shape
    Pp = w1_ref.shape[1]

    g = pl.program_id(0)
    n = pl.program_id(1)
    i = pl.program_id(2)
    n_img = pl.num_programs(1)
    tpg = pl.num_programs(2)          # row tiles per group

    step = n * tpg + i                # linear position in this group's DMA chain
    slot = step & 1
    tile = g * tpg + i                # row-tile index within the (halo-padded) image

    def issue(img, tile_idx, sl):
        # rows [tile_idx*TH, tile_idx*TH + TH + 2) of the H-padded input
        # == original rows [tile_idx*TH - 1, tile_idx*TH + TH] (zero halo at edges).
        pltpu.make_async_copy(
            xp_hbm.at[img, pl.ds(tile_idx * TH, TH + 2)],
            xbuf.at[sl],
            dma_sem.at[sl],
        ).start()

    # Prime only at the very first step of this group's chain (once per core).
    @pl.when((n == 0) & (i == 0))
    def _():
        issue(n, tile, slot)

    # Prefetch the next slab: next row tile of this image ...
    @pl.when(i + 1 < tpg)
    def _():
        issue(n, tile + 1, 1 - slot)

    # ... or row tile 0 of the NEXT image (hides the slab DMA across image boundaries).
    @pl.when((i + 1 == tpg) & (n + 1 < n_img))
    def _():
        issue(n + 1, g * tpg, 1 - slot)

    # Wait for the current tile's slab.
    pltpu.make_async_copy(
        xp_hbm.at[n, pl.ds(tile * TH, TH + 2)],
        xbuf.at[slot],
        dma_sem.at[slot],
    ).wait()

    # ---- conv1 (1x1, BN folded) + relu --------------------------------------
    x2d = xbuf[slot].reshape((TH + 2) * W, Cp)
    t1 = jnp.dot(x2d, w1_ref[...], preferred_element_type=jnp.float32)
    t1 = jnp.maximum(t1 + b1_ref[...], 0.0).reshape(TH + 2, W, Pp)      # f32

    # ---- K-stacked column taps [left | center | right] into VMEM scratch -----
    # Roll in f32 (robust lowering), mask edges with jnp.where (NaN/Inf-safe),
    # store bf16 into lane-aligned 128-wide slices of t1_ref.
    col = jax.lax.broadcasted_iota(jnp.int32, (1, W, 1), 1)
    t1_ref[:, :, Pp:2 * Pp] = t1.astype(jnp.bfloat16)                    # dx = 1
    left = pltpu.roll(t1, shift=1, axis=1)                               # col x-1
    t1_ref[:, :, 0:Pp] = jnp.where(col == 0, 0.0, left).astype(jnp.bfloat16)
    right = pltpu.roll(t1, shift=W - 1, axis=1)                          # col x+1
    t1_ref[:, :, 2 * Pp:3 * Pp] = jnp.where(col == W - 1, 0.0, right).astype(jnp.bfloat16)

    # ---- conv2 (3x3, stride 1, pad 1): 3 matmuls with K = 3*Pp, acc in VMEM ---
    acc_ref[...] = jnp.dot(t1_ref[0:TH].reshape(TH * W, 3 * Pp), w2k_ref[0],
                           preferred_element_type=jnp.float32)
    acc_ref[...] += jnp.dot(t1_ref[1:TH + 1].reshape(TH * W, 3 * Pp), w2k_ref[1],
                            preferred_element_type=jnp.float32)
    acc_ref[...] += jnp.dot(t1_ref[2:TH + 2].reshape(TH * W, 3 * Pp), w2k_ref[2],
                            preferred_element_type=jnp.float32)
    t2 = jnp.maximum(acc_ref[...] + b2_ref[...], 0.0).astype(jnp.bfloat16)

    # ---- conv3 (1x1, BN folded) + residual + relu ----------------------------
    t3 = jnp.dot(t2, w3_ref[...], preferred_element_type=jnp.float32) + b3_ref[...]
    resid = xbuf[slot, 1:TH + 1].reshape(TH * W, Cp).astype(jnp.float32)
    out = jnp.maximum(t3 + resid, 0.0)
    o_ref[0] = out.reshape(TH, W, Cp).astype(o_ref.dtype)


def _fold_bn(gamma, beta, mean, var):
    scale = gamma / jnp.sqrt(var + BN_EPS)
    bias = beta - mean * scale
    return scale, bias


def bottleneck_forward_nhwc(x_nhwc, params, *, row_tile=32, num_groups=2,
                            vmem_budget_bytes=20 * 1024 * 1024):
    """Core NHWC entry point (no layout transposes). x_nhwc: (N, H, W, Cin)."""
    N, H, W, Cin = x_nhwc.shape
    P = params["w1"].shape[1]
    assert Cin == P * EXPANSION, "downsample=None requires inplanes == planes*4"
    assert W % 8 == 0, "W must be a multiple of 8 (sublane alignment)"

    Pp = _round_up(P, _LANE)
    Cp = _round_up(Cin, _LANE)

    # ---- row-group / tile-height selection against a VMEM budget ------------
    G = num_groups if (num_groups > 1 and H % num_groups == 0
                       and H // num_groups >= 4) else 1
    rows_per_group = H // G
    TH = _largest_divisor_leq(rows_per_group, row_tile)

    def footprint(th):
        xbuf = 2 * (th + 2) * W * Cp * 2          # double-buffered input slab (bf16)
        taps = (th + 2) * W * 3 * Pp * 2          # K-stacked taps (bf16)
        acc = th * W * Pp * 4                     # conv2 accumulator (f32)
        outb = 2 * th * W * Cp * 2                # double-buffered output tile (bf16)
        wts = 2 * 2 * (Cp * Pp + 9 * Pp * Pp + Pp * Cp)   # bf16 weights, 2 buffers
        return xbuf + taps + acc + outb + wts

    while footprint(TH) > vmem_budget_bytes and TH > 1:
        TH = _largest_divisor_leq(rows_per_group, TH - 1)
    tiles_per_group = rows_per_group // TH

    # ---- fold BN into conv weights, pad channels to lane width, cast bf16 ----
    s1, b1 = _fold_bn(params["bn1_g"], params["bn1_b"], params["bn1_m"], params["bn1_v"])
    s2, b2 = _fold_bn(params["bn2_g"], params["bn2_b"], params["bn2_m"], params["bn2_v"])
    s3, b3 = _fold_bn(params["bn3_g"], params["bn3_b"], params["bn3_m"], params["bn3_v"])

    w1 = jnp.pad(params["w1"] * s1[None, :],
                 ((0, Cp - Cin), (0, Pp - P))).astype(jnp.bfloat16)
    w2 = jnp.pad(params["w2"] * s2[None, None, None, :],
                 ((0, 0), (0, 0), (0, Pp - P), (0, Pp - P)))
    # (dy, dx, cin, cout) -> (dy, dx*Pp + cin, cout): K-stacked taps along contraction.
    w2k = w2.reshape(3, 3 * Pp, Pp).astype(jnp.bfloat16)
    w3 = jnp.pad(params["w3"] * s3[None, :],
                 ((0, Pp - P), (0, Cp - Cin))).astype(jnp.bfloat16)
    b1p = jnp.pad(b1, (0, Pp - P)).reshape(1, Pp).astype(jnp.float32)
    b2p = jnp.pad(b2, (0, Pp - P)).reshape(1, Pp).astype(jnp.float32)
    b3p = jnp.pad(b3, (0, Cp - Cin)).reshape(1, Cp).astype(jnp.float32)

    # bf16 activations; +1 zero row top/bottom (3x3 halo), channels padded to Cp.
    xp = jnp.pad(x_nhwc.astype(jnp.bfloat16),
                 ((0, 0), (1, 1), (0, 0), (0, Cp - Cin)))

    def _const_spec(arr):
        rank = arr.ndim
        return pl.BlockSpec(arr.shape, lambda g, n, i: (0,) * rank)

    out_p = pl.pallas_call(
        _bottleneck_kernel,
        out_shape=jax.ShapeDtypeStruct((N, H, W, Cp), jnp.bfloat16),
        grid_spec=pltpu.PrefetchScalarGridSpec(
            num_scalar_prefetch=0,
            grid=(G, N, tiles_per_group),
            in_specs=[
                pl.BlockSpec(memory_space=pl.ANY),     # x stays in HBM; manual DMA
                _const_spec(w1), _const_spec(w2k), _const_spec(w3),
                _const_spec(b1p), _const_spec(b2p), _const_spec(b3p),
            ],
            out_specs=pl.BlockSpec(
                (1, TH, W, Cp),
                lambda g, n, i: (n, g * tiles_per_group + i, 0, 0)),
            scratch_shapes=[
                pltpu.VMEM((2, TH + 2, W, Cp), jnp.bfloat16),   # input slab (2 bufs)
                pltpu.SemaphoreType.DMA((2,)),
                pltpu.VMEM((TH + 2, W, 3 * Pp), jnp.bfloat16),  # K-stacked taps
                pltpu.VMEM((TH * W, Pp), jnp.float32),          # conv2 accumulator
            ],
        ),
        compiler_params=pltpu.CompilerParams(
            # Only the row-group axis is parallel so every core's (n, i) chain starts
            # at (0, 0) — keeps the manual-DMA prime/prefetch correct under megacore
            # while still using both v7x TensorCores at batch 1.
            dimension_semantics=("parallel", "arbitrary", "arbitrary"),
            # Budgeted tiles stay well below this; 48 MiB is safe on v7x (64 MiB
            # physical) and trivially safe on v5e/v6e (128 MiB).
            vmem_limit_bytes=48 * 1024 * 1024,
        ),
    )(xp, w1, w2k, w3, b1p, b2p, b3p)

    return out_p[..., :Cin]        # drop channel padding (stores were lane-dense)


def bottleneck_forward(x_nchw, params, *, row_tile=32, num_groups=2):
    """PyTorch-layout (NCHW) wrapper.

    Boundary conversion only — in a real NHWC pipeline these transposes disappear
    (keep activations NHWC end-to-end)."""
    x_nhwc = jnp.transpose(x_nchw, (0, 2, 3, 1))
    out = bottleneck_forward_nhwc(x_nhwc, params, row_tile=row_tile,
                                  num_groups=num_groups)
    return jnp.transpose(out, (0, 3, 1, 2)).astype(x_nchw.dtype)


def _reference_forward(x_nchw, params):
    """Pure-JAX f32 reference (lax convs, eval-mode BN) for verification."""
    x = jnp.transpose(x_nchw, (0, 2, 3, 1)).astype(jnp.float32)
    P = params["w1"].shape[1]

    def conv(inp, w_hwio, pad):
        return jax.lax.conv_general_dilated(
            inp, w_hwio, window_strides=(1, 1), padding=pad,
            dimension_numbers=("NHWC", "HWIO", "NHWC"))

    def bn(inp, g, b, m, v):
        return (inp - m) / jnp.sqrt(v + BN_EPS) * g + b

    out = conv(x, params["w1"].reshape(1, 1, -1, P), "VALID")
    out = jax.nn.relu(bn(out, params["bn1_g"], params["bn1_b"],
                         params["bn1_m"], params["bn1_v"]))
    out = conv(out, params["w2"], "SAME")
    out = jax.nn.relu(bn(out, params["bn2_g"], params["bn2_b"],
                         params["bn2_m"], params["bn2_v"]))
    out = conv(out, params["w3"].reshape(1, 1, P, -1), "VALID")
    out = bn(out, params["bn3_g"], params["bn3_b"],
             params["bn3_m"], params["bn3_v"])
    out = jax.nn.relu(out + x)
    return jnp.transpose(out, (0, 3, 1, 2))


def make_params(key, inplanes, planes):
    ks = jax.random.split(key, 9)
    cexp = planes * EXPANSION
    return {
        # conv weights stored channel-last / HWIO for the NHWC kernel
        "w1": 0.1 * jax.random.normal(ks[0], (inplanes, planes), jnp.float32),
        "w2": 0.1 * jax.random.normal(ks[1], (3, 3, planes, planes), jnp.float32),
        "w3": 0.1 * jax.random.normal(ks[2], (planes, cexp), jnp.float32),
        # BatchNorm affine params + running stats (deterministic, non-trivial)
        "bn1_g": 1.0 + 0.1 * jax.random.normal(ks[3], (planes,), jnp.float32),
        "bn1_b": 0.1 * jax.random.normal(ks[4], (planes,), jnp.float32),
        "bn1_m": 0.05 * jax.random.normal(ks[5], (planes,), jnp.float32),
        "bn1_v": jnp.abs(1.0 + 0.1 * jax.random.normal(ks[6], (planes,), jnp.float32)),
        "bn2_g": 1.0 + 0.05 * jnp.arange(planes, dtype=jnp.float32),
        "bn2_b": 0.02 * jnp.arange(planes, dtype=jnp.float32),
        "bn2_m": 0.01 * jnp.arange(planes, dtype=jnp.float32),
        "bn2_v": 1.0 + 0.03 * jnp.arange(planes, dtype=jnp.float32),
        "bn3_g": 1.0 + 0.1 * jax.random.normal(ks[7], (cexp,), jnp.float32),
        "bn3_b": 0.1 * jax.random.normal(ks[8], (cexp,), jnp.float32),
        "bn3_m": jnp.linspace(-0.1, 0.1, cexp, dtype=jnp.float32),
        "bn3_v": jnp.linspace(0.9, 1.1, cexp, dtype=jnp.float32),
    }


if __name__ == "__main__":
    key = jax.random.PRNGKey(0)
    k_x, k_p = jax.random.split(key)

    N, planes, H, W = 2, 4, 16, 16
    inplanes = planes * EXPANSION          # 16, required for downsample=None
    x = jax.random.normal(k_x, (N, inplanes, H, W), jnp.float32)  # NCHW input
    params = make_params(k_p, inplanes, planes)

    # grid = (2 row groups, 2 images, 1 tile/group); exercises the cross-image
    # prefetch chain and the per-group prime.
    out = bottleneck_forward(x, params)
    out = jax.block_until_ready(out)

    ref = _reference_forward(x, params)
    assert out.shape == (N, inplanes, H, W)
    # bf16 compute + bf16 BN-folded weights vs f32 reference -> loose-ish tolerance
    assert jnp.allclose(out.astype(jnp.float32), ref, atol=3e-2, rtol=3e-2), \
        "mismatch vs reference"

    print("KERNEL_OK")
</pallas_src>

<mosaic_0001>
module attributes {stable_mosaic.version = 11 : i64} {
  func.func @_bottleneck_kernel(%arg0: i32, %arg1: i32, %arg2: i32, %arg3: memref<2x18x16x128xbf16, #tpu.memory_space<any>>, %arg4: memref<128x128xbf16, #tpu.memory_space<vmem>>, %arg5: memref<3x384x128xbf16, #tpu.memory_space<vmem>>, %arg6: memref<128x128xbf16, #tpu.memory_space<vmem>>, %arg7: memref<1x128xf32, #tpu.memory_space<vmem>>, %arg8: memref<1x128xf32, #tpu.memory_space<vmem>>, %arg9: memref<1x128xf32, #tpu.memory_space<vmem>>, %arg10: memref<1x8x16x128xbf16, #tpu.memory_space<vmem>>, %arg11: memref<2x10x16x128xbf16, #tpu.memory_space<vmem>>, %arg12: memref<2x!tpu.dma_semaphore, #tpu.memory_space<semaphore_mem>>, %arg13: memref<10x16x384xbf16, #tpu.memory_space<vmem>>, %arg14: memref<128x128xf32, #tpu.memory_space<vmem>>) attributes {dimension_semantics = [#tpu.dimension_semantics<parallel>, #tpu.dimension_semantics<arbitrary>, #tpu.dimension_semantics<arbitrary>], iteration_bounds = array<i64: 2, 2, 1>, scalar_prefetch = 0 : i64, scratch_operands = 4 : i64, tpu.core_type = #tpu.core_type<tc>, window_params = [{}, {pipeline_mode = #tpu.pipeline_mode<synchronous>, transform_indices = @transform_1, window_bounds = array<i64: 128, 128>}, {pipeline_mode = #tpu.pipeline_mode<synchronous>, transform_indices = @transform_2, window_bounds = array<i64: 3, 384, 128>}, {pipeline_mode = #tpu.pipeline_mode<synchronous>, transform_indices = @transform_3, window_bounds = array<i64: 128, 128>}, {pipeline_mode = #tpu.pipeline_mode<synchronous>, transform_indices = @transform_4, window_bounds = array<i64: 1, 128>}, {pipeline_mode = #tpu.pipeline_mode<synchronous>, transform_indices = @transform_5, window_bounds = array<i64: 1, 128>}, {pipeline_mode = #tpu.pipeline_mode<synchronous>, transform_indices = @transform_6, window_bounds = array<i64: 1, 128>}, {transform_indices = @transform_7, window_bounds = array<i64: 1, 8, 16, 128>}]} {
    %c1_i32 = arith.constant 1 : i32
    %0 = arith.muli %arg1, %c1_i32 : i32
    %1 = arith.addi %0, %arg2 : i32
    %c1_i32_0 = arith.constant 1 : i32
    %2 = arith.andi %1, %c1_i32_0 : i32
    %c1_i32_1 = arith.constant 1 : i32
    %3 = arith.muli %arg0, %c1_i32_1 : i32
    %4 = arith.addi %3, %arg2 : i32
    %c0_i32 = arith.constant 0 : i32
    %5 = arith.cmpi eq, %arg1, %c0_i32 : i32
    %c0_i32_2 = arith.constant 0 : i32
    %6 = arith.cmpi eq, %arg2, %c0_i32_2 : i32
    %7 = arith.andi %5, %6 : i1
    %8 = arith.extui %7 : i1 to i32
    %c0_i32_3 = arith.constant 0 : i32
    %9 = arith.cmpi ne, %8, %c0_i32_3 : i32
    scf.if %9 {
      %c8_i32_82 = arith.constant 8 : i32
      %108 = arith.muli %4, %c8_i32_82 : i32
      %c0_i32_83 = arith.constant 0 : i32
      %c0_i32_84 = arith.constant 0 : i32
      %109 = tpu.memref_slice %arg3[%arg1, %108, %c0_i32_83, %c0_i32_84] : memref<2x18x16x128xbf16, #tpu.memory_space<any>> -> memref<1x10x16x128xbf16, #tpu.memory_space<any>>
      %110 = tpu.memref_squeeze %109 : memref<1x10x16x128xbf16, #tpu.memory_space<any>> -> memref<10x16x128xbf16, #tpu.memory_space<any>>
      %c0_i32_85 = arith.constant 0 : i32
      %c0_i32_86 = arith.constant 0 : i32
      %c0_i32_87 = arith.constant 0 : i32
      %111 = tpu.memref_slice %arg11[%2, %c0_i32_85, %c0_i32_86, %c0_i32_87] : memref<2x10x16x128xbf16, #tpu.memory_space<vmem>> -> memref<1x10x16x128xbf16, #tpu.memory_space<vmem>>
      %112 = tpu.memref_squeeze %111 : memref<1x10x16x128xbf16, #tpu.memory_space<vmem>> -> memref<10x16x128xbf16, #tpu.memory_space<vmem>>
      %113 = tpu.memref_slice %arg12[%2] : memref<2x!tpu.dma_semaphore, #tpu.memory_space<semaphore_mem>> -> memref<1x!tpu.dma_semaphore, #tpu.memory_space<semaphore_mem>>
      %114 = tpu.memref_squeeze %113 : memref<1x!tpu.dma_semaphore, #tpu.memory_space<semaphore_mem>> -> memref<!tpu.dma_semaphore, #tpu.memory_space<semaphore_mem>>
      tpu.enqueue_dma source(%110 : memref<10x16x128xbf16, #tpu.memory_space<any>>) target(%112 : memref<10x16x128xbf16, #tpu.memory_space<vmem>>) target_semaphore(%114 : memref<!tpu.dma_semaphore, #tpu.memory_space<semaphore_mem>>)
    } else {
    }
    %c1_i32_4 = arith.constant 1 : i32
    %10 = arith.addi %arg2, %c1_i32_4 : i32
    %c1_i32_5 = arith.constant 1 : i32
    %11 = arith.cmpi slt, %10, %c1_i32_5 : i32
    %12 = arith.extui %11 : i1 to i32
    %c0_i32_6 = arith.constant 0 : i32
    %13 = arith.cmpi ne, %12, %c0_i32_6 : i32
    scf.if %13 {
      %c1_i32_82 = arith.constant 1 : i32
      %108 = arith.addi %4, %c1_i32_82 : i32
      %c1_i32_83 = arith.constant 1 : i32
      %109 = arith.subi %c1_i32_83, %2 : i32
      %c8_i32_84 = arith.constant 8 : i32
      %110 = arith.muli %108, %c8_i32_84 : i32
      %c0_i32_85 = arith.constant 0 : i32
      %c0_i32_86 = arith.constant 0 : i32
      %111 = tpu.memref_slice %arg3[%arg1, %110, %c0_i32_85, %c0_i32_86] : memref<2x18x16x128xbf16, #tpu.memory_space<any>> -> memref<1x10x16x128xbf16, #tpu.memory_space<any>>
      %112 = tpu.memref_squeeze %111 : memref<1x10x16x128xbf16, #tpu.memory_space<any>> -> memref<10x16x128xbf16, #tpu.memory_space<any>>
      %c0_i32_87 = arith.constant 0 : i32
      %c0_i32_88 = arith.constant 0 : i32
      %c0_i32_89 = arith.constant 0 : i32
      %113 = tpu.memref_slice %arg11[%109, %c0_i32_87, %c0_i32_88, %c0_i32_89] : memref<2x10x16x128xbf16, #tpu.memory_space<vmem>> -> memref<1x10x16x128xbf16, #tpu.memory_space<vmem>>
      %114 = tpu.memref_squeeze %113 : memref<1x10x16x128xbf16, #tpu.memory_space<vmem>> -> memref<10x16x128xbf16, #tpu.memory_space<vmem>>
      %115 = tpu.memref_slice %arg12[%109] : memref<2x!tpu.dma_semaphore, #tpu.memory_space<semaphore_mem>> -> memref<1x!tpu.dma_semaphore, #tpu.memory_space<semaphore_mem>>
      %116 = tpu.memref_squeeze %115 : memref<1x!tpu.dma_semaphore, #tpu.memory_space<semaphore_mem>> -> memref<!tpu.dma_semaphore, #tpu.memory_space<semaphore_mem>>
      tpu.enqueue_dma source(%112 : memref<10x16x128xbf16, #tpu.memory_space<any>>) target(%114 : memref<10x16x128xbf16, #tpu.memory_space<vmem>>) target_semaphore(%116 : memref<!tpu.dma_semaphore, #tpu.memory_space<semaphore_mem>>)
    } else {
    }
    %c1_i32_7 = arith.constant 1 : i32
    %14 = arith.addi %arg2, %c1_i32_7 : i32
    %c1_i32_8 = arith.constant 1 : i32
    %15 = arith.cmpi eq, %14, %c1_i32_8 : i32
    %c1_i32_9 = arith.constant 1 : i32
    %16 = arith.addi %arg1, %c1_i32_9 : i32
    %c2_i32 = arith.constant 2 : i32
    %17 = arith.cmpi slt, %16, %c2_i32 : i32
    %18 = arith.andi %15, %17 : i1
    %19 = arith.extui %18 : i1 to i32
    %c0_i32_10 = arith.constant 0 : i32
    %20 = arith.cmpi ne, %19, %c0_i32_10 : i32
    scf.if %20 {
      %c1_i32_82 = arith.constant 1 : i32
      %108 = arith.addi %arg1, %c1_i32_82 : i32
      %c1_i32_83 = arith.constant 1 : i32
      %109 = arith.muli %arg0, %c1_i32_83 : i32
      %c1_i32_84 = arith.constant 1 : i32
      %110 = arith.subi %c1_i32_84, %2 : i32
      %c8_i32_85 = arith.constant 8 : i32
      %111 = arith.muli %109, %c8_i32_85 : i32
      %c0_i32_86 = arith.constant 0 : i32
      %c0_i32_87 = arith.constant 0 : i32
      %112 = tpu.memref_slice %arg3[%108, %111, %c0_i32_86, %c0_i32_87] : memref<2x18x16x128xbf16, #tpu.memory_space<any>> -> memref<1x10x16x128xbf16, #tpu.memory_space<any>>
      %113 = tpu.memref_squeeze %112 : memref<1x10x16x128xbf16, #tpu.memory_space<any>> -> memref<10x16x128xbf16, #tpu.memory_space<any>>
      %c0_i32_88 = arith.constant 0 : i32
      %c0_i32_89 = arith.constant 0 : i32
      %c0_i32_90 = arith.constant 0 : i32
      %114 = tpu.memref_slice %arg11[%110, %c0_i32_88, %c0_i32_89, %c0_i32_90] : memref<2x10x16x128xbf16, #tpu.memory_space<vmem>> -> memref<1x10x16x128xbf16, #tpu.memory_space<vmem>>
      %115 = tpu.memref_squeeze %114 : memref<1x10x16x128xbf16, #tpu.memory_space<vmem>> -> memref<10x16x128xbf16, #tpu.memory_space<vmem>>
      %116 = tpu.memref_slice %arg12[%110] : memref<2x!tpu.dma_semaphore, #tpu.memory_space<semaphore_mem>> -> memref<1x!tpu.dma_semaphore, #tpu.memory_space<semaphore_mem>>
      %117 = tpu.memref_squeeze %116 : memref<1x!tpu.dma_semaphore, #tpu.memory_space<semaphore_mem>> -> memref<!tpu.dma_semaphore, #tpu.memory_space<semaphore_mem>>
      tpu.enqueue_dma source(%113 : memref<10x16x128xbf16, #tpu.memory_space<any>>) target(%115 : memref<10x16x128xbf16, #tpu.memory_space<vmem>>) target_semaphore(%117 : memref<!tpu.dma_semaphore, #tpu.memory_space<semaphore_mem>>)
    } else {
    }
    %c8_i32 = arith.constant 8 : i32
    %21 = arith.muli %4, %c8_i32 : i32
    %c0_i32_11 = arith.constant 0 : i32
    %c0_i32_12 = arith.constant 0 : i32
    %22 = tpu.memref_slice %arg3[%arg1, %21, %c0_i32_11, %c0_i32_12] : memref<2x18x16x128xbf16, #tpu.memory_space<any>> -> memref<1x10x16x128xbf16, #tpu.memory_space<any>>
    %23 = tpu.memref_squeeze %22 : memref<1x10x16x128xbf16, #tpu.memory_space<any>> -> memref<10x16x128xbf16, #tpu.memory_space<any>>
    %c0_i32_13 = arith.constant 0 : i32
    %c0_i32_14 = arith.constant 0 : i32
    %c0_i32_15 = arith.constant 0 : i32
    %24 = tpu.memref_slice %arg11[%2, %c0_i32_13, %c0_i32_14, %c0_i32_15] : memref<2x10x16x128xbf16, #tpu.memory_space<vmem>> -> memref<1x10x16x128xbf16, #tpu.memory_space<vmem>>
    %25 = tpu.memref_squeeze %24 : memref<1x10x16x128xbf16, #tpu.memory_space<vmem>> -> memref<10x16x128xbf16, #tpu.memory_space<vmem>>
    %26 = tpu.memref_slice %arg12[%2] : memref<2x!tpu.dma_semaphore, #tpu.memory_space<semaphore_mem>> -> memref<1x!tpu.dma_semaphore, #tpu.memory_space<semaphore_mem>>
    %27 = tpu.memref_squeeze %26 : memref<1x!tpu.dma_semaphore, #tpu.memory_space<semaphore_mem>> -> memref<!tpu.dma_semaphore, #tpu.memory_space<semaphore_mem>>
    tpu.wait_dma2 semaphore(%27 : memref<!tpu.dma_semaphore, #tpu.memory_space<semaphore_mem>>) src(%23 : memref<10x16x128xbf16, #tpu.memory_space<any>>) dst(%25 : memref<10x16x128xbf16, #tpu.memory_space<vmem>>)
    %28 = arith.index_cast %2 : i32 to index
    %c0 = arith.constant 0 : index
    %c0_16 = arith.constant 0 : index
    %c0_17 = arith.constant 0 : index
    %29 = vector.load %arg11[%28, %c0, %c0_16, %c0_17] : memref<2x10x16x128xbf16, #tpu.memory_space<vmem>>, vector<1x10x16x128xbf16>
    %30 = vector.shape_cast %29 : vector<1x10x16x128xbf16> to vector<10x16x128xbf16>
    %31 = vector.shape_cast %30 : vector<10x16x128xbf16> to vector<160x128xbf16>
    %c0_18 = arith.constant 0 : index
    %c0_19 = arith.constant 0 : index
    %32 = vector.load %arg4[%c0_18, %c0_19] : memref<128x128xbf16, #tpu.memory_space<vmem>>, vector<128x128xbf16>
    %cst = arith.constant dense<0.000000e+00> : vector<160x128xf32>
    %33 = tpu.matmul %31, %32, %cst {dimension_numbers = #tpu.dot_dimension_numbers<[1], [0], [0], [1], [0, 0, 1, 1], [], []>} : vector<160x128xbf16>, vector<128x128xbf16>, vector<160x128xf32> -> vector<160x128xf32>
    %c0_20 = arith.constant 0 : index
    %c0_21 = arith.constant 0 : index
    %34 = vector.load %arg7[%c0_20, %c0_21] : memref<1x128xf32, #tpu.memory_space<vmem>>, vector<1x128xf32>
    %35 = vector.broadcast %34 : vector<1x128xf32> to vector<160x128xf32>
    %36 = arith.addf %33, %35 : vector<160x128xf32>
    %cst_22 = arith.constant 0.000000e+00 : f32
    %37 = vector.broadcast %cst_22 : f32 to vector<160x128xf32>
    %38 = arith.maximumf %36, %37 : vector<160x128xf32>
    %39 = vector.shape_cast %38 : vector<160x128xf32> to vector<10x16x128xf32>
    %40 = tpu.iota {dimensions = array<i32: 1>} : vector<1x16x1xi32>
    %41 = arith.truncf %39 : vector<10x16x128xf32> to vector<10x16x128xbf16>
    %c0_23 = arith.constant 0 : index
    %c0_24 = arith.constant 0 : index
    %c128 = arith.constant 128 : index
    %42 = vector.load %arg13[%c0_23, %c0_24, %c128] : memref<10x16x384xbf16, #tpu.memory_space<vmem>>, vector<10x16x128xbf16>
    tpu.vector_store %arg13[%c0_23, %c0_24, %c128], %41 {strides = array<i32>} : memref<10x16x384xbf16, #tpu.memory_space<vmem>>, vector<10x16x128xbf16>,
    %c1_i32_25 = arith.constant 1 : i32
    %43 = tpu.dynamic_rotate %39 by %c1_i32_25 dim 1 : vector<10x16x128xf32>, i32 -> vector<10x16x128xf32>
    %c0_i32_26 = arith.constant 0 : i32
    %44 = vector.broadcast %c0_i32_26 : i32 to vector<1x16x1xi32>
    %45 = arith.cmpi eq, %40, %44 : vector<1x16x1xi32>
    %cst_27 = arith.constant 0.000000e+00 : f32
    %46 = vector.shape_cast %45 : vector<1x16x1xi1> to vector<1x16x1xi1>
    %47 = vector.broadcast %46 : vector<1x16x1xi1> to vector<10x16x128xi1>
    %48 = vector.broadcast %cst_27 : f32 to vector<10x16x128xf32>
    %49 = arith.select %47, %48, %43 : vector<10x16x128xi1>, vector<10x16x128xf32>
    %50 = arith.truncf %49 : vector<10x16x128xf32> to vector<10x16x128xbf16>
    %c0_28 = arith.constant 0 : index
    %c0_29 = arith.constant 0 : index
    %c0_30 = arith.constant 0 : index
    %51 = vector.load %arg13[%c0_28, %c0_29, %c0_30] : memref<10x16x384xbf16, #tpu.memory_space<vmem>>, vector<10x16x128xbf16>
    tpu.vector_store %arg13[%c0_28, %c0_29, %c0_30], %50 {strides = array<i32>} : memref<10x16x384xbf16, #tpu.memory_space<vmem>>, vector<10x16x128xbf16>,
    %c15_i32 = arith.constant 15 : i32
    %52 = tpu.dynamic_rotate %39 by %c15_i32 dim 1 : vector<10x16x128xf32>, i32 -> vector<10x16x128xf32>
    %c15_i32_31 = arith.constant 15 : i32
    %53 = vector.broadcast %c15_i32_31 : i32 to vector<1x16x1xi32>
    %54 = arith.cmpi eq, %40, %53 : vector<1x16x1xi32>
    %cst_32 = arith.constant 0.000000e+00 : f32
    %55 = vector.shape_cast %54 : vector<1x16x1xi1> to vector<1x16x1xi1>
    %56 = vector.broadcast %55 : vector<1x16x1xi1> to vector<10x16x128xi1>
    %57 = vector.broadcast %cst_32 : f32 to vector<10x16x128xf32>
    %58 = arith.select %56, %57, %52 : vector<10x16x128xi1>, vector<10x16x128xf32>
    %59 = arith.truncf %58 : vector<10x16x128xf32> to vector<10x16x128xbf16>
    %c0_33 = arith.constant 0 : index
    %c0_34 = arith.constant 0 : index
    %c256 = arith.constant 256 : index
    %60 = vector.load %arg13[%c0_33, %c0_34, %c256] : memref<10x16x384xbf16, #tpu.memory_space<vmem>>, vector<10x16x128xbf16>
    tpu.vector_store %arg13[%c0_33, %c0_34, %c256], %59 {strides = array<i32>} : memref<10x16x384xbf16, #tpu.memory_space<vmem>>, vector<10x16x128xbf16>,
    %c0_35 = arith.constant 0 : index
    %c0_36 = arith.constant 0 : index
    %c0_37 = arith.constant 0 : index
    %61 = vector.load %arg13[%c0_35, %c0_36, %c0_37] : memref<10x16x384xbf16, #tpu.memory_space<vmem>>, vector<8x16x384xbf16>
    %62 = vector.shape_cast %61 : vector<8x16x384xbf16> to vector<128x384xbf16>
    %c0_38 = arith.constant 0 : index
    %c0_39 = arith.constant 0 : index
    %c0_40 = arith.constant 0 : index
    %63 = vector.load %arg5[%c0_38, %c0_39, %c0_40] : memref<3x384x128xbf16, #tpu.memory_space<vmem>>, vector<1x384x128xbf16>
    %64 = vector.shape_cast %63 : vector<1x384x128xbf16> to vector<384x128xbf16>
    %cst_41 = arith.constant dense<0.000000e+00> : vector<128x128xf32>
    %65 = tpu.matmul %62, %64, %cst_41 {dimension_numbers = #tpu.dot_dimension_numbers<[1], [0], [0], [1], [0, 0, 1, 1], [], []>} : vector<128x384xbf16>, vector<384x128xbf16>, vector<128x128xf32> -> vector<128x128xf32>
    %c0_42 = arith.constant 0 : index
    %c0_43 = arith.constant 0 : index
    %66 = vector.load %arg14[%c0_42, %c0_43] : memref<128x128xf32, #tpu.memory_space<vmem>>, vector<128x128xf32>
    tpu.vector_store %arg14[%c0_42, %c0_43], %65 {strides = array<i32>} : memref<128x128xf32, #tpu.memory_space<vmem>>, vector<128x128xf32>,
    %c0_44 = arith.constant 0 : index
    %c0_45 = arith.constant 0 : index
    %67 = vector.load %arg14[%c0_44, %c0_45] : memref<128x128xf32, #tpu.memory_space<vmem>>, vector<128x128xf32>
    %c1 = arith.constant 1 : index
    %c0_46 = arith.constant 0 : index
    %c0_47 = arith.constant 0 : index
    %68 = vector.load %arg13[%c1, %c0_46, %c0_47] : memref<10x16x384xbf16, #tpu.memory_space<vmem>>, vector<8x16x384xbf16>
    %69 = vector.shape_cast %68 : vector<8x16x384xbf16> to vector<128x384xbf16>
    %c1_48 = arith.constant 1 : index
    %c0_49 = arith.constant 0 : index
    %c0_50 = arith.constant 0 : index
    %70 = vector.load %arg5[%c1_48, %c0_49, %c0_50] : memref<3x384x128xbf16, #tpu.memory_space<vmem>>, vector<1x384x128xbf16>
    %71 = vector.shape_cast %70 : vector<1x384x128xbf16> to vector<384x128xbf16>
    %cst_51 = arith.constant dense<0.000000e+00> : vector<128x128xf32>
    %72 = tpu.matmul %69, %71, %cst_51 {dimension_numbers = #tpu.dot_dimension_numbers<[1], [0], [0], [1], [0, 0, 1, 1], [], []>} : vector<128x384xbf16>, vector<384x128xbf16>, vector<128x128xf32> -> vector<128x128xf32>
    %73 = arith.addf %67, %72 : vector<128x128xf32>
    %c0_52 = arith.constant 0 : index
    %c0_53 = arith.constant 0 : index
    %74 = vector.load %arg14[%c0_52, %c0_53] : memref<128x128xf32, #tpu.memory_space<vmem>>, vector<128x128xf32>
    tpu.vector_store %arg14[%c0_52, %c0_53], %73 {strides = array<i32>} : memref<128x128xf32, #tpu.memory_space<vmem>>, vector<128x128xf32>,
    %c0_54 = arith.constant 0 : index
    %c0_55 = arith.constant 0 : index
    %75 = vector.load %arg14[%c0_54, %c0_55] : memref<128x128xf32, #tpu.memory_space<vmem>>, vector<128x128xf32>
    %c2 = arith.constant 2 : index
    %c0_56 = arith.constant 0 : index
    %c0_57 = arith.constant 0 : index
    %76 = vector.load %arg13[%c2, %c0_56, %c0_57] : memref<10x16x384xbf16, #tpu.memory_space<vmem>>, vector<8x16x384xbf16>
    %77 = vector.shape_cast %76 : vector<8x16x384xbf16> to vector<128x384xbf16>
    %c2_58 = arith.constant 2 : index
    %c0_59 = arith.constant 0 : index
    %c0_60 = arith.constant 0 : index
    %78 = vector.load %arg5[%c2_58, %c0_59, %c0_60] : memref<3x384x128xbf16, #tpu.memory_space<vmem>>, vector<1x384x128xbf16>
    %79 = vector.shape_cast %78 : vector<1x384x128xbf16> to vector<384x128xbf16>
    %cst_61 = arith.constant dense<0.000000e+00> : vector<128x128xf32>
    %80 = tpu.matmul %77, %79, %cst_61 {dimension_numbers = #tpu.dot_dimension_numbers<[1], [0], [0], [1], [0, 0, 1, 1], [], []>} : vector<128x384xbf16>, vector<384x128xbf16>, vector<128x128xf32> -> vector<128x128xf32>
    %81 = arith.addf %75, %80 : vector<128x128xf32>
    %c0_62 = arith.constant 0 : index
    %c0_63 = arith.constant 0 : index
    %82 = vector.load %arg14[%c0_62, %c0_63] : memref<128x128xf32, #tpu.memory_space<vmem>>, vector<128x128xf32>
    tpu.vector_store %arg14[%c0_62, %c0_63], %81 {strides = array<i32>} : memref<128x128xf32, #tpu.memory_space<vmem>>, vector<128x128xf32>,
    %c0_64 = arith.constant 0 : index
    %c0_65 = arith.constant 0 : index
    %83 = vector.load %arg14[%c0_64, %c0_65] : memref<128x128xf32, #tpu.memory_space<vmem>>, vector<128x128xf32>
    %c0_66 = arith.constant 0 : index
    %c0_67 = arith.constant 0 : index
    %84 = vector.load %arg8[%c0_66, %c0_67] : memref<1x128xf32, #tpu.memory_space<vmem>>, vector<1x128xf32>
    %85 = vector.broadcast %84 : vector<1x128xf32> to vector<128x128xf32>
    %86 = arith.addf %83, %85 : vector<128x128xf32>
    %cst_68 = arith.constant 0.000000e+00 : f32
    %87 = vector.broadcast %cst_68 : f32 to vector<128x128xf32>
    %88 = arith.maximumf %86, %87 : vector<128x128xf32>
    %89 = arith.truncf %88 : vector<128x128xf32> to vector<128x128xbf16>
    %c0_69 = arith.constant 0 : index
    %c0_70 = arith.constant 0 : index
    %90 = vector.load %arg6[%c0_69, %c0_70] : memref<128x128xbf16, #tpu.memory_space<vmem>>, vector<128x128xbf16>
    %cst_71 = arith.constant dense<0.000000e+00> : vector<128x128xf32>
    %91 = tpu.matmul %89, %90, %cst_71 {dimension_numbers = #tpu.dot_dimension_numbers<[1], [0], [0], [1], [0, 0, 1, 1], [], []>} : vector<128x128xbf16>, vector<128x128xbf16>, vector<128x128xf32> -> vector<128x128xf32>
    %c0_72 = arith.constant 0 : index
    %c0_73 = arith.constant 0 : index
    %92 = vector.load %arg9[%c0_72, %c0_73] : memref<1x128xf32, #tpu.memory_space<vmem>>, vector<1x128xf32>
    %93 = vector.broadcast %92 : vector<1x128xf32> to vector<128x128xf32>
    %94 = arith.addf %91, %93 : vector<128x128xf32>
    %95 = arith.index_cast %2 : i32 to index
    %c1_74 = arith.constant 1 : index
    %c0_75 = arith.constant 0 : index
    %c0_76 = arith.constant 0 : index
    %96 = vector.load %arg11[%95, %c1_74, %c0_75, %c0_76] : memref<2x10x16x128xbf16, #tpu.memory_space<vmem>>, vector<1x8x16x128xbf16>
    %97 = vector.shape_cast %96 : vector<1x8x16x128xbf16> to vector<8x16x128xbf16>
    %98 = vector.shape_cast %97 : vector<8x16x128xbf16> to vector<128x128xbf16>
    %99 = arith.extf %98 : vector<128x128xbf16> to vector<128x128xf32>
    %100 = arith.addf %94, %99 : vector<128x128xf32>
    %cst_77 = arith.constant 0.000000e+00 : f32
    %101 = vector.broadcast %cst_77 : f32 to vector<128x128xf32>
    %102 = arith.maximumf %100, %101 : vector<128x128xf32>
    %103 = vector.shape_cast %102 : vector<128x128xf32> to vector<8x16x128xf32>
    %104 = arith.truncf %103 : vector<8x16x128xf32> to vector<8x16x128xbf16>
    %c0_78 = arith.constant 0 : index
    %c0_79 = arith.constant 0 : index
    %c0_80 = arith.constant 0 : index
    %c0_81 = arith.constant 0 : index
    %105 = vector.load %arg10[%c0_78, %c0_79, %c0_80, %c0_81] : memref<1x8x16x128xbf16, #tpu.memory_space<vmem>>, vector<1x8x16x128xbf16>
    %106 = vector.shape_cast %105 : vector<1x8x16x128xbf16> to vector<8x16x128xbf16>
    %107 = vector.shape_cast %104 : vector<8x16x128xbf16> to vector<1x8x16x128xbf16>
    tpu.vector_store %arg10[%c0_78, %c0_79, %c0_80, %c0_81], %107 {strides = array<i32>} : memref<1x8x16x128xbf16, #tpu.memory_space<vmem>>, vector<1x8x16x128xbf16>,
    return
  }
  func.func @transform_1(%arg0: i32, %arg1: i32, %arg2: i32) -> (i32, i32) {
    %c0_i32 = arith.constant 0 : i32
    %c0_i32_0 = arith.constant 0 : i32
    %c0_i32_1 = arith.constant 0 : i32
    return %c0_i32, %c0_i32_0 : i32, i32
  }
  func.func @transform_2(%arg0: i32, %arg1: i32, %arg2: i32) -> (i32, i32, i32) {
    %c0_i32 = arith.constant 0 : i32
    %c0_i32_0 = arith.constant 0 : i32
    %c0_i32_1 = arith.constant 0 : i32
    %c0_i32_2 = arith.constant 0 : i32
    return %c0_i32, %c0_i32_0, %c0_i32_1 : i32, i32, i32
  }
  func.func @transform_3(%arg0: i32, %arg1: i32, %arg2: i32) -> (i32, i32) {
    %c0_i32 = arith.constant 0 : i32
    %c0_i32_0 = arith.constant 0 : i32
    %c0_i32_1 = arith.constant 0 : i32
    return %c0_i32, %c0_i32_0 : i32, i32
  }
  func.func @transform_4(%arg0: i32, %arg1: i32, %arg2: i32) -> (i32, i32) {
    %c0_i32 = arith.constant 0 : i32
    %c0_i32_0 = arith.constant 0 : i32
    %c0_i32_1 = arith.constant 0 : i32
    return %c0_i32, %c0_i32_0 : i32, i32
  }
  func.func @transform_5(%arg0: i32, %arg1: i32, %arg2: i32) -> (i32, i32) {
    %c0_i32 = arith.constant 0 : i32
    %c0_i32_0 = arith.constant 0 : i32
    %c0_i32_1 = arith.constant 0 : i32
    return %c0_i32, %c0_i32_0 : i32, i32
  }
  func.func @transform_6(%arg0: i32, %arg1: i32, %arg2: i32) -> (i32, i32) {
    %c0_i32 = arith.constant 0 : i32
    %c0_i32_0 = arith.constant 0 : i32
    %c0_i32_1 = arith.constant 0 : i32
    return %c0_i32, %c0_i32_0 : i32, i32
  }
  func.func @transform_7(%arg0: i32, %arg1: i32, %arg2: i32) -> (i32, i32, i32, i32) {
    %c1_i32 = arith.constant 1 : i32
    %0 = arith.muli %arg0, %c1_i32 : i32
    %1 = arith.addi %0, %arg2 : i32
    %c0_i32 = arith.constant 0 : i32
    %c0_i32_0 = arith.constant 0 : i32
    %c0_i32_1 = arith.constant 0 : i32
    return %arg1, %1, %c0_i32, %c0_i32_0 : i32, i32, i32, i32
  }
}

</mosaic_0001>

<bundles_post_ra>
// kernel: tpu_custom_call.1
= control target key start
LH: loop header
LB: loop body
LE: loop exit
PB: predicated region body
PF: predicated region fallthrough
CT: control target
= control target key end

     0   :  { %12 = vsyncpa [#allocation7], 0  ;;  %s5032_s0 = inlined_call_operand.hbm [shape: bf16[2,18,16,128], index: 0, kind: input, shape index: {}]   ;;  %s5033_s1 = inlined_call_operand.hbm [shape: bf16[128,128], index: 1, kind: input, shape index: {}]   ;;  %s5034_s2 = inlined_call_operand.hbm [shape: bf16[3,384,128], index: 2, kind: input, shape index: {}]   ;;  %s5035_s3 = inlined_call_operand.hbm [shape: bf16[128,128], index: 3, kind: input, shape index: {}]   ;;  %s5036_s4 = inlined_call_operand.vmem [shape: f32[1,128], index: 4, kind: input, shape index: {}]   ;;  %s5037_s5 = inlined_call_operand.vmem [shape: f32[1,128], index: 5, kind: input, shape index: {}]   ;;  %s5038_s6 = inlined_call_operand.vmem [shape: f32[1,128], index: 6, kind: input, shape index: {}]   ;;  %s5039_s7 = inlined_call_operand.hbm [shape: bf16[2,16,16,128], index: 7, kind: output, shape index: {}]  }
   0x1   :  { %13 = vsyncpa [#allocation10], 0 }
   0x2   :  { %14 = vsyncpa [#allocation8], 0 }
   0x3   :  { %16 = vsyncpa [#allocation8 + $0x1], 0  ;;  %s4131_s24 = smov 0   ;;  %s4133_s25 = smov 0  }
   0x4   :  { %s4135_s26 = smov 0   ;;  %s4137_s27 = smov 0  }
   0x5   :  { %s4139_s28 = smov 0   ;;  %s4141_s29 = smov 0  }
   0x6   :  { %s4143_s30 = smov 0   ;;  %s4145_s8 = smov 0  }
   0x7 LB: > { %5055 = sst [smem:[#allocation25_spill]] %s4051_s24  ;;  %s2689_s9 = sadd.s32 4294967295, %s4079_s8   ;;  %s4079_s8 = sphi %s4145_s8, %s22_s8   ;;  %s4075_s30 = sphi %s4143_s30, %s5089_s30   ;;  %s4071_s29 = sphi %s4141_s29, %s5088_s29   ;;  %s4067_s28 = sphi %s4139_s28, %s5087_s28   ;;  %s4063_s27 = sphi %s4137_s27, %s5086_s27   ;;  %s4059_s26 = sphi %s4135_s26, %s5085_s26   ;;  %s4055_s25 = sphi %s4133_s25, %s5091_s25   ;;  %s4051_s24 = sphi %s4131_s24, %s5090_s24  }
   0x8   : > { %5056 = sst [smem:[#allocation26_spill]] %s4059_s26  ;;  %s2690_s10 = sadd.s32 4294967294, %s4079_s8  }
   0x9   : > { %5057 = sst [smem:[#allocation27_spill]] %s4071_s29  ;;  %s37_s11 = sadd.s32 1, %s4071_s29 }
   0xa   : > { %5058 = sst [smem:[#allocation28_spill]] %s4075_s30  ;;  %s41_s12 = sadd.s32 1, %s4075_s30 }
   0xb   : > { %p39_p0 = scmp.ge.s32.totalorder %s37_s11, 2  ;;  %s178_s13 = sadd.s32 1, %s4059_s26 }
   0xc   : > { %p188_p1 = scmp.ne.s32.totalorder %s4059_s26, %s4055_s25  ;;  %p189_p2 = scmp.eq.s32.totalorder %s2689_s9, 3 }
   0xd   : > { %s5093_s11 = smov (%p39_p0, %s37_s11), 0  ;;  %s5095_s12 = smov (!%p39_p0, %s41_s12), %s4075_s30 }
   0xe   : > { %5059 = sst [smem:[#allocation29_spill]] %s5093_s11  ;;  %s173_s14 = ssub.s32 %s4071_s29, %s5093_s11 }
   0xf   : > { %p4183_p3 = por %p189_p2, %p188_p1  ;;  %p43_p4 = scmp.ge.s32.totalorder %s5095_s12, 2 }
  0x10   : > { %p194_p5 = scmp.ne.s32.totalorder %s4055_s25, %s4051_s24  ;;  %p195_p6 = scmp.eq.s32.totalorder %s2690_s10, 3 }
  0x11   : > { %s5060_s15 = scalar_select %p4183_p3, 1, 0 }
  0x12   : > { %p2691_p7 = scmp.ge.s32.totalorder %s4079_s8, 1  ;;  %s5097_s12 = smov (%p43_p4, %s5095_s12), 0 }
  0x13   : > { %5061 = sst [smem:[#allocation30_spill]] %s5097_s12  ;;  %p4192_p8 = por %p195_p6, %p194_p5 }
  0x14   : > { %p202_p9 = scmp.lt.s32.totalorder %s4079_s8, 5  ;;  %s174_s17 = ssub.s32 %s4075_s30, %s5097_s12 }
  0x15   : > { %s5062_s16 = scalar_select %p4192_p8, 1, 0 }
  0x16   : > { %s175_s18 = sor.u32 %s174_s17, %s173_s14  ;;  %p4199_p10 = pnand %p2691_p7, %p202_p9 }
  0x17   : > { %5063 = sst [smem:[#allocation31_spill]] %s5062_s16  ;;  %p176_p11 = scmp.eq.s32.totalorder %s175_s18, 0 }
  0x18   : > { %s5064_s19 = scalar_select %p4199_p10, 1, 0 }
  0x19   : > { %p4203_p12 = scmp.eq.s32.totalorder %s2689_s9, 0  ;;  %p3651_p13 = pneg %p4199_p10 }
  0x1a   : > { %s4210_s21 = scalar_select %p176_p11, %s4059_s26, %s178_s13  }
  0x1b   : > { %s5065_s20 = scalar_select %p4203_p12, 1, 0 }
  0x1c   : > { %5066 = sst [smem:[#allocation32_spill]] %s4210_s21  ;;  %p4214_p0 = pnand %p4203_p12, %p3651_p13 }
  0x1d   : > { %s4081_s23 = smov [#allocation9]   ;;  %s3834_s9 = scalar_lea.hbm %s5034_s2, 9216 }
  0x1e   : > { %s227_s10 = sshll.u32 %s4081_s23, 4  ;;  %p3835_p1 = scmp.ne.s32.totalorder %s5034_s2, %s3834_s9  ;;  %s228_s10 = int_to_ptr.vmem [resolvable:$true] %s227_s10 }
  0x1f   : > { %p4226_p2 = pneg %p4214_p0  ;;  %p3841_p6 = scmp.lt.u32.totalorder %s3834_s9, %s5034_s2 }
  0x21   : > { %p3837_p4 = pnand %p4226_p2, %p3835_p1 }
  0x23   : > { %p3838_p5 = pneg %p3837_p4 }
  0x25   : > { %p3843_p7 = pnand %p3841_p6, %p3838_p5 }
  0x27   : > { %3846 = shalt.err (!%p3843_p7)
}
  0x28   : > { %s3847_s14 = scalar_lea.vmem %s228_s10, 9216  ;;  %p3855_p8 = scmp.lt.s32.totalorder %s228_s10, %s228_s10 }
  0x29   : > { %p3848_p9 = scmp.ne.s32.totalorder %s228_s10, %s3847_s14  ;;  %p3856_p3 = scmp.lt.s32.totalorder %s3847_s14, %s3847_s14 }
  0x2b   : > { %p3850_p11 = pnand %p3848_p9, %p4226_p2  ;;  %p3857_p12 = por %p3856_p3, %p3855_p8 }
  0x2d   : > { %p3851_p13 = pneg %p3850_p11 }
  0x2f   : > { %p3858_p10 = pnand %p3857_p12, %p3851_p13 }
  0x31   : > { %3861 = shalt.err (!%p3858_p10)
}
  0x32   : > { %s4082_s12 = smov 64   ;;  %s4083_s17 = smov 4  }
  0x33   : > { %3657 = dma.hbm_to_vmem [thread:$0]  (!%p4214_p0), %s5034_s2, 9216, %s228_s10, [#allocation10], %s4082_s12, %s4082_s12, %s4083_s17  }
  0x34   : > { %s4084_s18 = smov [#allocation6]   ;;  %s4085_s30 = smov [#allocation11]  }
  0x35   : > { %s214_s23 = sshll.u32 %s4084_s18, 4  ;;  %s240_s29 = sshll.u32 %s4085_s30, 4  ;;  %s215_s23 = int_to_ptr.vmem [resolvable:$true] %s214_s23  ;;  %s4245_s29 = int_to_ptr.vmem [resolvable:$true] %s240_s29 }
  0x36   : > { %s3862_s26 = scalar_lea.hbm %s5033_s1, 1024 }
  0x37   : > { %p3863_p3 = scmp.ne.s32.totalorder %s5033_s1, %s3862_s26  ;;  %p3869_p12 = scmp.lt.u32.totalorder %s3862_s26, %s5033_s1 }
  0x39   : > { %p3865_p8 = pnand %p3863_p3, %p4226_p2 }
  0x3b   : > { %p3866_p10 = pneg %p3865_p8 }
  0x3d   : > { %p3871_p1 = pnand %p3869_p12, %p3866_p10 }
  0x3f   : > { %3874 = shalt.err (!%p3871_p1)
}
  0x40   : > { %s3875_s30 = scalar_lea.vmem %s215_s23, 1024  ;;  %p3883_p7 = scmp.lt.s32.totalorder %s215_s23, %s215_s23 }
  0x41   : > { %p3876_p4 = scmp.ne.s32.totalorder %s215_s23, %s3875_s30  ;;  %p3884_p9 = scmp.lt.s32.totalorder %s3875_s30, %s3875_s30 }
  0x43   : > { %p3878_p5 = pnand %p3876_p4, %p4226_p2  ;;  %p3885_p11 = por %p3884_p9, %p3883_p7 }
  0x45   : > { %p3879_p6 = pneg %p3878_p5 }
  0x47   : > { %p3886_p13 = pnand %p3885_p11, %p3879_p6 }
  0x49   : > { %3889 = shalt.err (!%p3886_p13)
}
  0x4a   : > { %3654 = dma.hbm_to_vmem [thread:$0]  (!%p4214_p0), %s5033_s1, 1024, %s215_s23, [#allocation7], %s4082_s12, %s4082_s12, %s4083_s17  }
  0x4b   : > { %s3890_s9 = scalar_lea.hbm %s5035_s3, 1024 }
  0x4c   : > { %p3891_p3 = scmp.ne.s32.totalorder %s5035_s3, %s3890_s9  ;;  %p3897_p12 = scmp.lt.u32.totalorder %s3890_s9, %s5035_s3 }
  0x4e   : > { %p3893_p8 = pnand %p3891_p3, %p4226_p2 }
  0x50   : > { %p3894_p10 = pneg %p3893_p8 }
  0x52   : > { %p3899_p1 = pnand %p3897_p12, %p3894_p10 }
  0x54   : > { %3902 = shalt.err (!%p3899_p1)
}
  0x55   : > { %s3903_s23 = scalar_lea.vmem %s4245_s29, 1024  ;;  %p3911_p7 = scmp.lt.s32.totalorder %s4245_s29, %s4245_s29 }
  0x56   : > { %p3904_p4 = scmp.ne.s32.totalorder %s4245_s29, %s3903_s23  ;;  %p3912_p9 = scmp.lt.s32.totalorder %s3903_s23, %s3903_s23 }
  0x58   : > { %p3906_p5 = pnand %p3904_p4, %p4226_p2  ;;  %p3913_p11 = por %p3912_p9, %p3911_p7 }
  0x5a   : > { %p3907_p6 = pneg %p3906_p5 }
  0x5c   : > { %p3914_p13 = pnand %p3913_p11, %p3907_p6 }
  0x5e   : > { %3917 = shalt.err (!%p3914_p13)
}
  0x5f   : > { %3660 = dma.hbm_to_vmem [thread:$0]  (!%p4214_p0), %s5035_s3, 1024, %s4245_s29, [#allocation10], %s4082_s12, %s4082_s12, %s4083_s17  }
  0x60   : > { %p5069_p3 = scmp.ne.s32.totalorder %s5064_s19, 0 }
  0x61   : > { %p5070_p2 = scmp.ne.s32.totalorder (!%p5069_p3), %s5065_s20, 0 }
  0x62   : > { %265 = sbr.rel (%p5069_p3) target bundleno = 1039 (0x40f), region = 44 }
  0x69   : > { %4036 = dma.done.wait (%p5070_p2), [#allocation7], 1024  }
  0x6a   : > { %4038 = vsyncadd (%p5070_p2), [#allocation7], 4294966272 }
  0x6b   : > { %4040 = dma.done.wait (%p5070_p2), [#allocation10], 10240  }
  0x6c   : > { %4042 = vsyncadd (%p5070_p2), [#allocation10], 4294957056  ;;  %s5051_s29 = sand.u32 1, %s4055_s25   ;;  %s4310_s22 = sand.u32 1, %s4063_s27 }
  0x6d   : > { %s4307_s19 = sshll.u32 %s5051_s29, 6  ;;  %s5052_s13 = sshll.u32 %s4067_s28, 4 }
  0x6e   : > { %s312_s20 = smul.u32 36, %s4063_s27  ;;  %p304_p0 = scmp.eq.s32.totalorder %s4063_s27, 0 }
  0x6f   : > { %s2840_s12 = smul.u32 80, %s4310_s22  ;;  %s360_s11 = sadd.s32 1, %s4063_s27 }
  0x70   : > { %s313_s17 = sadd.s32 %s5052_s13, %s312_s20  ;;  %s4330_s10 = scalar_lea.sflag [#allocation3], %s4310_s22 }
  0x71   : > { %s2703_s26 = sshll.u32 %s313_s17, 6  ;;  %s4323_s18 = scalar_lea.vmem [#allocation2], %s2840_s12 }
  0x72   : > { %s4321_s9 = scalar_lea.hbm %s5032_s0, %s2703_s26  ;;  %s327_s14 = sshll.u32 %s4323_s18, 4  ;;  %s4326_s14 = int_to_ptr.vmem [resolvable:$true] %s327_s14 }
  0x73   : > { %s3918_s23 = scalar_lea.hbm %s4321_s9, 1280  ;;  %s5054_s20 = scalar_lea.hbm %s5032_s0, 4608 }
  0x74   : > { %p3919_p8 = scmp.ne.s32.totalorder %s4321_s9, %s3918_s23  ;;  %p3923_p1 = scmp.lt.u32.totalorder %s4321_s9, %s5032_s0 }
  0x75   : > { %p3924_p4 = scmp.lt.u32.totalorder %s5054_s20, %s3918_s23  ;;  %p3926_p6 = scmp.lt.u32.totalorder %s3918_s23, %s4321_s9 }
  0x76   : > { %p3920_p10 = pnand %p3919_p8, %p304_p0 }
  0x77   : > { %p3925_p5 = por %p3924_p4, %p3923_p1 }
  0x78   : > { %p3921_p12 = pneg %p3920_p10 }
  0x79   : > { %p3927_p7 = por %p3926_p6, %p3925_p5 }
  0x7b   : > { %p3928_p9 = pnand %p3927_p7, %p3921_p12 }
  0x7d   : > { %3931 = shalt.err (!%p3928_p9)  }
  0x7e   : > { %s3932_s21 = scalar_lea.vmem %s4326_s14, 1280  ;;  %s4086_s30 = smov [#allocation2]  }
  0x7f   : > { %p3933_p11 = scmp.ne.s32.totalorder %s4326_s14, %s3932_s21  ;;  %s3936_s24 = sshll.u32 %s4086_s30, 4  ;;  %s4352_s24 = int_to_ptr.vmem [resolvable:$false] %s3936_s24 }
  0x80   : > { %s5053_s23 = scalar_lea.vmem %s4352_s24, 2560  ;;  %p3939_p2 = scmp.lt.s32.totalorder %s4326_s14, %s4352_s24 }
  0x81   : > { %p3934_p13 = pnand %p3933_p11, %p304_p0  ;;  %p3940_p8 = scmp.lt.s32.totalorder %s5053_s23, %s3932_s21 }
  0x83   : > { %p3935_p3 = pneg %p3934_p13  ;;  %p3941_p10 = por %p3940_p8, %p3939_p2 }
  0x85   : > { %p3942_p12 = pnand %p3941_p10, %p3935_p3 }
  0x87   : > { %3945 = shalt.err (!%p3942_p12)  }
  0x88   : > { %3647 = dma.hbm_to_vmem [thread:$0]  (%p304_p0), %s4321_s9, 1280, %s4326_s14, %s4330_s10 }
  0x89   : > { %s366_s17 = ssub.s32 1, %s4310_s22  ;;  %s2610_s12 = scalar_lea.hbm %s4321_s9, 2304 }
  0x8a   : > { %s2843_s26 = smul.u32 80, %s366_s17  ;;  %p4368_p1 = scmp.lt.s32.totalorder %s360_s11, 2 }
  0x8b   : > { %s376_s29 = scalar_lea.sflag [#allocation3], %s366_s17  ;;  %s3974_s13 = scalar_lea.hbm %s4321_s9, 3584 }
  0x8c   : > { %s375_s21 = scalar_lea.vmem [#allocation2], %s2843_s26  ;;  %p3947_p4 = scmp.ne.s32.totalorder %s2610_s12, %s3974_s13 }
  0x8d   : > { %s384_s30 = sshll.u32 %s375_s21, 4  ;;  %p3951_p0 = scmp.lt.u32.totalorder %s2610_s12, %s5032_s0  ;;  %s385_s30 = int_to_ptr.vmem [resolvable:$true] %s384_s30 }
  0x8e   : > { %p3948_p5 = pnand %p3947_p4, %p4368_p1  ;;  %s5072_s11 = scalar_lea.hbm %s5032_s0, 4608 }
  0x8f   : > { %p3952_p7 = scmp.lt.u32.totalorder %s5072_s11, %s3974_s13  ;;  %p3954_p11 = scmp.lt.u32.totalorder %s3974_s13, %s2610_s12 }
  0x90   : > { %p3949_p6 = pneg %p3948_p5 }
  0x91   : > { %p3953_p9 = por %p3952_p7, %p3951_p0 }
  0x93   : > { %p3955_p13 = por %p3954_p11, %p3953_p9 }
  0x95   : > { %p3956_p3 = pnand %p3955_p13, %p3949_p6 }
  0x97   : > { %3959 = shalt.err (!%p3956_p3)  }
  0x98   : > { %s3960_s17 = scalar_lea.vmem %s385_s30, 1280  ;;  %p3967_p12 = scmp.lt.s32.totalorder %s385_s30, %s4352_s24 }
  0x99   : > { %p3961_p2 = scmp.ne.s32.totalorder %s385_s30, %s3960_s17  ;;  %s5073_s9 = scalar_lea.vmem %s4352_s24, 2560 }
  0x9a   : > { %p3968_p4 = scmp.lt.s32.totalorder %s5073_s9, %s3960_s17 }
  0x9b   : > { %p3962_p8 = pnand %p3961_p2, %p4368_p1 }
  0x9c   : > { %p3969_p5 = por %p3968_p4, %p3967_p12 }
  0x9d   : > { %p3963_p10 = pneg %p3962_p8 }
  0x9f   : > { %p3970_p0 = pnand %p3969_p5, %p3963_p10 }
  0xa1   : > { %3973 = shalt.err (!%p3970_p0)  }
  0xa2   : > { %3648 = dma.hbm_to_vmem [thread:$0]  (%p4368_p1), %s2610_s12, 1280, %s385_s30, %s376_s29 }
  0xa3   : > { %s4390_s13 = scalar_lea.vmem [#allocation12], %s4307_s19 }
  0xa4   : > { %4043 = dma.done.wait %s4330_s10, 1280 }
  0xa5   : > { %4044 = vsyncadd %s4330_s10, 4294966016  ;;  %v3746_v0 = vld [vmem:[#allocation6] sm:$0xff]   ;;  %v3747_v1 = vld [vmem:[#allocation6 + $0x8] sm:$0xff]   ;;  %v611_v37 = vlaneseq  ;;  %vm4087_vm4 = vmmov 1   ;;  %s2832_s26 = sshll.u32 %s4063_s27, 5  ;;  %s2542_s16 = sshll.u32 %s4390_s13, 4  ;;  %s4974_s16 = int_to_ptr.vmem [resolvable:$true] %s2542_s16 }
  0xa6   : > { %3375 = vmatprep.subr.bf16.mxu0 %v3746_v0  ;;  %3539 = vmatprep.subr.bf16.mxu1 %v3746_v0  ;;  %v3748_v2 = vld [vmem:[#allocation6 + $0x10] sm:$0xff]   ;;  %v3749_v3 = vld [vmem:[#allocation6 + $0x18] sm:$0xff]   ;;  %v3750_v6 = vld [vmem:[#allocation6 + $0x20] sm:$0xff]   ;;  %s5079_s14 = sand.u32 1, %s4055_s25   ;;  %s3975_s11 = scalar_lea.vmem %s4974_s16, 1024 }
  0xa7   : > { %3376 = vmatpush3.bf16.msra.mxu0 %v3746_v0  ;;  %3547 = vmatpush3.bf16.msra.mxu1 %v3746_v0  ;;  %v397_v4 = vld [vmem:[%s4323_s18] sm:$0xff]  ;;  %v3751_v7 = vld [vmem:[#allocation6 + $0x28] sm:$0xff]   ;;  %v3753_v9 = vld [vmem:[#allocation6 + $0x38] sm:$0xff]   ;;  %v4404_v40 = vshrl.u32 %v611_v37, 7  ;;  %s4980_s22 = scalar_lea.sflag [#allocation8], %s5079_s14  ;;  %p3976_p1 = scmp.ne.s32.totalorder %s4974_s16, %s3975_s11 }
  0xa8   : > { %3377 = vmatprep.subr.bf16.mxu0 %v3747_v1  ;;  %3540 = vmatprep.subr.bf16.mxu1 %v3747_v1  ;;  %v405_v5 = vld [vmem:[%s4323_s18 + $0x40] sm:$0xff]  ;;  %v398_v12 = vld [vmem:[%s4323_s18 + $0x8] sm:$0xff]  ;;  %v399_v15 = vld [vmem:[%s4323_s18 + $0x10] sm:$0xff]  ;;  %p5080_p6 = scmp.ne.s32.totalorder %s5060_s15, 0  ;;  %s4088_s17 = smov [#allocation12]  }
  0xa9   : > { %3391 = vmatprep.mubr.bf16.mxu0 %v397_v4  ;;  %3407 = vmatprep.mubr.bf16.mxu1 %v405_v5  ;;  %v3752_v8 = vld [vmem:[#allocation6 + $0x30] sm:$0xff]   ;;  %v3754_v10 = vld [vmem:[#allocation9 + $0x40] sm:$0xff]   ;;  %v406_v13 = vld [vmem:[%s4323_s18 + $0x48] sm:$0xff]  ;;  %v4407_v42 = vadd.s32 8, %v4404_v40  ;;  %vm741_vm0 = vcmp.lt.s32.totalorder %v4404_v40, 7  ;;  %vm3671_vm1 = vcmp.ne.s32.totalorder %v4404_v40, 0 }
  0xaa   : > { %v3755_v11 = vld [vmem:[#allocation9 + $0x80] sm:$0xff]   ;;  %v3757_v16 = vld [vmem:[#allocation9 + $0x48] sm:$0xff]   ;;  %v3760_v19 = vld [vmem:[#allocation9 + $0x50] sm:$0xff]   ;;  %vm654_vm2 = vcmp.lt.s32.totalorder %v4404_v40, 1  ;;  %p3977_p7 = pnand %p3976_p1, %p5080_p6  ;;  %s3979_s9 = sshll.u32 %s4088_s17, 4  ;;  %s3980_s9 = int_to_ptr.vmem [resolvable:$false] %s3979_s9 }
  0xab   : > { %3378 = vmatpush3.bf16.msra.mxu0 %v3747_v1  ;;  %3548 = vmatpush3.bf16.msra.mxu1 %v3747_v1  ;;  %v3756_v14 = vld [vmem:[#allocation9] sm:$0xff]   ;;  %v3758_v17 = vld [vmem:[#allocation9 + $0x88] sm:$0xff]   ;;  %v3761_v20 = vld [vmem:[#allocation9 + $0x90] sm:$0xff]   ;;  %vm3672_vm3 = vcmp.ne.s32.totalorder %v4407_v42, 15  ;;  %s3981_s29 = scalar_lea.vmem %s3980_s9, 2048  ;;  %p3982_p11 = scmp.lt.s32.totalorder %s4974_s16, %s3980_s9 }
  0xac   : > { %3379 = vmatprep.subr.bf16.mxu0 %v3748_v2  ;;  %3541 = vmatprep.subr.bf16.mxu1 %v3748_v2  ;;  %v3759_v18 = vld [vmem:[#allocation9 + $0x8] sm:$0xff]   ;;  %v3762_v22 = vld [vmem:[#allocation9 + $0x10] sm:$0xff]   ;;  %v3763_v24 = vld [vmem:[#allocation9 + $0x58] sm:$0xff]   ;;  %p3978_p9 = pneg %p3977_p7  ;;  %p3983_p13 = scmp.lt.s32.totalorder %s3981_s29, %s3975_s11 }
  0xad   : > { %v400_v21 = vld [vmem:[%s4323_s18 + $0x18] sm:$0xff]  ;;  %v401_v23 = vld [vmem:[%s4323_s18 + $0x20] sm:$0xff]  ;;  %v402_v29 = vld [vmem:[%s4323_s18 + $0x28] sm:$0xff] }
  0xae   : > { %v3764_v25 = vld [vmem:[#allocation9 + $0x98] sm:$0xff]   ;;  %v3766_v27 = vld [vmem:[#allocation9 + $0x60] sm:$0xff]   ;;  %v3769_v33 = vld [vmem:[#allocation9 + $0x68] sm:$0xff]   ;;  %p3984_p3 = por %p3983_p13, %p3982_p11 }
  0xaf   : > { %3380 = vmatpush3.bf16.msra.mxu0 %v3748_v2  ;;  %3549 = vmatpush3.bf16.msra.mxu1 %v3748_v2  ;;  %v3765_v26 = vld [vmem:[#allocation9 + $0x18] sm:$0xff]   ;;  %v3767_v28 = vld [vmem:[#allocation9 + $0xa0] sm:$0xff]   ;;  %v3770_v34 = vld [vmem:[#allocation9 + $0xa8] sm:$0xff]  }
  0xb0   : > { %3381 = vmatprep.subr.bf16.mxu0 %v3749_v3  ;;  %3542 = vmatprep.subr.bf16.mxu1 %v3749_v3  ;;  %v3768_v30 = vld [vmem:[#allocation9 + $0x20] sm:$0xff]   ;;  %v404_v32 = vld [vmem:[%s4323_s18 + $0x38] sm:$0xff]  ;;  %v3772_v36 = vld [vmem:[#allocation9 + $0x70] sm:$0xff]   ;;  %p3985_p2 = pnand %p3984_p3, %p3978_p9 }
  0xb1   : > { %v403_v31 = vld [vmem:[%s4323_s18 + $0x30] sm:$0xff]  ;;  %v3771_v35 = vld [vmem:[#allocation9 + $0x28] sm:$0xff]   ;;  %v3775_v41 = vld [vmem:[#allocation9 + $0x78] sm:$0xff]  }
  0xb2   : > { %v3773_v38 = vld [vmem:[#allocation9 + $0xb0] sm:$0xff]   ;;  %v3776_v43 = vld [vmem:[#allocation9 + $0xb8] sm:$0xff]   ;;  %v4409_v45 = vld [vmem:[#allocation9 + $0x140] sm:$0xff]  }
  0xb3   : > { %3382 = vmatpush3.bf16.msra.mxu0 %v3749_v3  ;;  %3550 = vmatpush3.bf16.msra.mxu1 %v3749_v3  ;;  %v3774_v39 = vld [vmem:[#allocation9 + $0x30] sm:$0xff]   ;;  %v3777_v44 = vld [vmem:[#allocation9 + $0x38] sm:$0xff]   ;;  %v3785_v46 = vld [vmem:[#allocation9 + $0x100] sm:$0xff]  }
  0xb4   : > { %3383 = vmatprep.subr.bf16.mxu0 %v3750_v6  ;;  %3543 = vmatprep.subr.bf16.mxu1 %v3750_v6  ;;  %v4415_v47 = vld [vmem:[%s5036_s4] ss:$0 sm:$0xff]  ;;  %vm4453_vm5 = vmpackc.low %vm4087_vm4, %vm3671_vm1 }
  0xb5   : > { %vm4470_vm6 = vmpackc.low %vm3672_vm3, %vm4087_vm4  ;;  %v3789_v40 = vld [vmem:[#allocation9 + $0x180] sm:$0xff]  }
  0xb7   : > { %3384 = vmatpush3.bf16.msra.mxu0 %v3750_v6  ;;  %3551 = vmatpush3.bf16.msra.mxu1 %v3750_v6 }
  0xb8   : > { %3385 = vmatprep.subr.bf16.mxu0 %v3751_v7  ;;  %3544 = vmatprep.subr.bf16.mxu1 %v3751_v7 }
  0xbb   : > { %3386 = vmatpush3.bf16.msra.mxu0 %v3751_v7  ;;  %3552 = vmatpush3.bf16.msra.mxu1 %v3751_v7 }
  0xbc   : > { %3387 = vmatprep.subr.bf16.mxu0 %v3752_v8  ;;  %3545 = vmatprep.subr.bf16.mxu1 %v3752_v8 }
  0xbf   : > { %3388 = vmatpush3.bf16.msra.mxu0 %v3752_v8  ;;  %3553 = vmatpush3.bf16.msra.mxu1 %v3752_v8 }
  0xc0   : > { %3389 = vmatprep.subr.bf16.mxu0 %v3753_v9  ;;  %3546 = vmatprep.subr.bf16.mxu1 %v3753_v9 }
  0xc3   : > { %3390 = vmatpush3.bf16.msra.mxu0 %v3753_v9  ;;  %3554 = vmatpush3.bf16.msra.mxu1 %v3753_v9 }
  0xc4   : > { %3119 = vmatprep.subr.bf16.mxu1 %v3754_v10  ;;  %3411 = vmatprep.subr.bf16.mxu0 %v3755_v11 }
  0xc6   : > { %3392 = vmatmul.mubr.bf16.vlgmr.msra.gmra.mrb[0].mxu0 %v398_v12  ;;  %3408 = vmatmul.mubr.bf16.vlgmr.msra.gmra.mrb[0].mxu1 %v406_v13 }
  0xc7   : > { %3395 = vmatprep.mubr.bf16.mxu0 %v399_v15  ;;  %3120 = vmatpush3.bf16.msra.mxu1 %v3756_v14 }
  0xc8   : > { %3412 = vmatpush3.bf16.msra.mxu0 %v3755_v11  ;;  %3121 = vmatprep.subr.bf16.mxu1 %v3757_v16 }
  0xc9   : > { %3413 = vmatprep.subr.bf16.mxu0 %v3758_v17 }
  0xcb   : > { %3122 = vmatpush3.bf16.msra.mxu1 %v3759_v18 }
  0xcc   : > { %3414 = vmatpush3.bf16.msra.mxu0 %v3758_v17  ;;  %3123 = vmatprep.subr.bf16.mxu1 %v3760_v19 }
  0xcd   : > { %3415 = vmatprep.subr.bf16.mxu0 %v3761_v20 }
  0xce   : > { %3396 = vmatmul.mubr.bf16.gmra.mrb[4].mxu0 %v400_v21 }
  0xcf   : > { %3399 = vmatprep.mubr.bf16.mxu0 %v401_v23  ;;  %3124 = vmatpush3.bf16.msra.mxu1 %v3762_v22 }
  0xd0   : > { %3416 = vmatpush3.bf16.msra.mxu0 %v3761_v20  ;;  %3125 = vmatprep.subr.bf16.mxu1 %v3763_v24 }
  0xd1   : > { %3417 = vmatprep.subr.bf16.mxu0 %v3764_v25 }
  0xd3   : > { %3126 = vmatpush3.bf16.msra.mxu1 %v3765_v26  ;;  %v3827_v26 = vld [vmem:[#allocation11 + $0x8] sm:$0xff]  }
  0xd4   : > { %3418 = vmatpush3.bf16.msra.mxu0 %v3764_v25  ;;  %3127 = vmatprep.subr.bf16.mxu1 %v3766_v27 }
  0xd5   : > { %3419 = vmatprep.subr.bf16.mxu0 %v3767_v28 }
  0xd6   : > { %3400 = vmatmul.mubr.bf16.gmra.mrb[8].mxu0 %v402_v29 }
  0xd7   : > { %3403 = vmatprep.mubr.bf16.mxu0 %v403_v31  ;;  %3128 = vmatpush3.bf16.msra.mxu1 %v3768_v30 }
  0xd8   : > { %3420 = vmatpush3.bf16.msra.mxu0 %v3767_v28  ;;  %3129 = vmatprep.subr.bf16.mxu1 %v3769_v33 }
  0xd9   : > { %3421 = vmatprep.subr.bf16.mxu0 %v3770_v34 }
  0xdb   : > { %3130 = vmatpush3.bf16.msra.mxu1 %v3771_v35 }
  0xdc   : > { %3422 = vmatpush3.bf16.msra.mxu0 %v3770_v34  ;;  %3131 = vmatprep.subr.bf16.mxu1 %v3772_v36 }
  0xdd   : > { %3423 = vmatprep.subr.bf16.mxu0 %v3773_v38 }
  0xde   : > { %3404 = vmatmul.mubr.bf16.gmra.mrb[12].mxu0 %v404_v32  ;;  %v3786_v32 = vld [vmem:[#allocation9 + $0xc0] sm:$0xff]  }
  0xdf   : > { %3132 = vmatpush3.bf16.msra.mxu1 %v3774_v39  ;;  %v3832_v39 = vld [vmem:[#allocation11 + $0x30] sm:$0xff]  }
  0xe0   : > { %3424 = vmatpush3.bf16.msra.mxu0 %v3773_v38  ;;  %3133 = vmatprep.subr.bf16.mxu1 %v3775_v41  ;;  %v3790_v38 = vld [vmem:[#allocation9 + $0x108] sm:$0xff]  }
  0xe1   : > { %3425 = vmatprep.subr.bf16.mxu0 %v3776_v43 }
  0xe3   : > { %3134 = vmatpush3.bf16.msra.mxu1 %v3777_v44 }
  0xe4   : > { %3426 = vmatpush3.bf16.msra.mxu0 %v3776_v43  ;;  %3199 = vmatprep.subr.bf16.mxu1 %v3785_v46 }
  0xe5   : > { %3443 = vmatprep.subr.bf16.mxu0 %v4409_v45 }
 0x199   : > { %v3393_v48 = vpop.f32.mrb[0].mxu0  ;;  %v3409_v49 = vpop.f32.mrb[0].mxu1 }
 0x19a   : > { %v521_v50 = vadd.f32 %v3393_v48, %v4415_v47  ;;  %v512_v51 = vpop.f32.mrb[1].mxu0  ;;  %v585_v52 = vadd.f32 %v3409_v49, %v4415_v47  ;;  %v576_v53 = vpop.f32.mrb[1].mxu1 }
 0x19b   : > { %v513_v54 = vadd.f32 %v4415_v47, %v512_v51  ;;  %v3394_v55 = vpop.f32.mrb[2].mxu0  ;;  %v577_v56 = vadd.f32 %v4415_v47, %v576_v53  ;;  %v3410_v57 = vpop.f32.mrb[2].mxu1 }
 0x19c   : > { %v593_v58 = vmax.f32 %v521_v50, 0.0  ;;  %v524_v59 = vadd.f32 %v3394_v55, %v4415_v47  ;;  %v515_v60 = vpop.f32.mrb[3].mxu0  ;;  %v4426_v61 = vmax.f32 %v585_v52, 0.0  ;;  %v4429_v62 = vadd.f32 %v3410_v57, %v4415_v47  ;;  %v579_v63 = vpop.f32.mrb[3].mxu1 }
 0x19d   : > { %v591_v0 = vmax.f32 %v513_v54, 0.0  ;;  %v516_v1 = vadd.f32 %v4415_v47, %v515_v60  ;;  %v4432_v2 = vmax.f32 %v577_v56, 0.0  ;;  %v4435_v3 = vadd.f32 %v4415_v47, %v579_v63  ;;  %v3779_v54 = vld [vmem:[#allocation9 + $0x148] sm:$0xff]  }
 0x19e   : > { %v635_v4 = vrot.slane %v593_v58, 7  ;;  %v722_v5 = vrot.slane %v593_v58, 1  ;;  %v594_v6 = vmax.f32 %v524_v59, 0.0  ;;  %v643_v7 = vrot.slane %v4426_v61, 7  ;;  %v3791_v59 = vld [vmem:[#allocation9 + $0xc8] sm:$0xff]  }
 0x19f   : > { %v634_v8 = vrot.slane %v591_v0, 7  ;;  %v721_v9 = vrot.slane %v591_v0, 1  ;;  %v592_v10 = vmax.f32 %v516_v1, 0.0  ;;  %v730_v11 = vrot.slane %v4426_v61, 1 }
 0x1a0   : > { %v645_v12 = vrot.slane %v594_v6, 7  ;;  %v732_v13 = vrot.slane %v594_v6, 1  ;;  %v4439_v14 = vpack.c.bf16 %v594_v6, %v593_v58  ;;  %v642_v15 = vrot.slane %v4432_v2, 7 }
 0x1a1   : > { %v644_v16 = vrot.slane %v592_v10, 7  ;;  %v731_v17 = vrot.slane %v592_v10, 1  ;;  %v3397_v18 = vpop.f32.mrb[4].mxu0  ;;  %v614_v19 = vpack.c.bf16 %v592_v10, %v591_v0  ;;  %v729_v20 = vrot.slane %v4432_v2, 1 }
 0x1a2   : > { %v743_v21 = vsel %vm741_vm0, %v722_v5, %v732_v13  ;;  %v753_v22 = vsel %vm741_vm0, %v732_v13, %v722_v5  ;;  %v537_v23 = vadd.f32 %v3397_v18, %v4415_v47  ;;  %v528_v24 = vpop.f32.mrb[5].mxu0  ;;  %v656_v25 = vsel %vm654_vm2, %v635_v4, %v645_v12  ;;  %v3794_v5 = vld [vmem:[#allocation9 + $0x110] sm:$0xff]  }
 0x1a3   : > { %v4457_v27 = vpack.c.bf16 %v753_v22, %v743_v21  ;;  %v655_v28 = vsel %vm654_vm2, %v634_v8, %v644_v16  ;;  %v665_v29 = vsel %vm654_vm2, %v644_v16, %v634_v8  ;;  %v529_v30 = vadd.f32 %v4415_v47, %v528_v24  ;;  %v3398_v31 = vpop.f32.mrb[6].mxu0  ;;  %1056 = vmatprep.mubr.bf16.mxu1 %v614_v19 }
 0x1a4   : > { %v2911_v33 = vpack.c.bf16 %v655_v28, %v665_v29  ;;  %v597_v34 = vmax.f32 %v537_v23, 0.0  ;;  %v540_v35 = vadd.f32 %v3398_v31, %v4415_v47  ;;  %v531_v36 = vpop.f32.mrb[7].mxu0  ;;  %v742_v37 = vsel %vm741_vm0, %v721_v9, %v731_v17 }
 0x1a5   : > { %v595_v41 = vmax.f32 %v529_v30, 0.0  ;;  %v532_v43 = vadd.f32 %v4415_v47, %v531_v36  ;;  %v752_v44 = vsel %vm741_vm0, %v731_v17, %v721_v9  ;;  %v666_v46 = vsel %vm654_vm2, %v645_v12, %v635_v4  ;;  %v3780_v17 = vld [vmem:[#allocation9 + $0x150] sm:$0xff]  }
 0x1a6   : > { %v637_v48 = vrot.slane %v597_v34, 7  ;;  %v724_v49 = vrot.slane %v597_v34, 1  ;;  %v598_v50 = vmax.f32 %v540_v35, 0.0  ;;  %2912 = vmatmul.mubr.msk.bf16.vlgmr.msra.gmra.mrb[4].mxu1 %vm4453_vm5, %v2911_v33  ;;  %v2943_v42 = vpack.c.bf16 %v752_v44, %v742_v37 }
 0x1a7   : > { %v636_v51 = vrot.slane %v595_v41, 7  ;;  %v723_v52 = vrot.slane %v595_v41, 1  ;;  %v596_v53 = vmax.f32 %v532_v43, 0.0  ;;  %1064 = vmatprep.mubr.bf16.mxu1 %v4439_v14  ;;  %v4482_v55 = vpack.c.bf16 %v656_v25, %v666_v46  ;;  %3200 = vmatpush3.bf16.msra.mxu1 %v3786_v32  ;;  %v3796_v25 = vld [vmem:[#allocation9 + $0xd0] sm:$0xff]   ;;  %v3798_v32 = vld [vmem:[#allocation9 + $0x118] sm:$0xff]  }
 0x1a8   : > { %v647_v56 = vrot.slane %v598_v50, 7  ;;  %v734_v57 = vrot.slane %v598_v50, 1  ;;  %3427 = vmatprep.mubr.msk.bf16.mxu0 %vm4470_vm6, %v2943_v42  ;;  %v4486_v58 = vpack.c.bf16 %v598_v50, %v597_v34  ;;  %3201 = vmatprep.subr.bf16.mxu1 %v3790_v38  ;;  %v4489_v60 = vmax.f32 %v4429_v62, 0.0  ;;  %v3781_v43 = vld [vmem:[#allocation9 + $0x158] sm:$0xff]  }
 0x1a9   : > { %v646_v63 = vrot.slane %v596_v53, 7  ;;  %v733_v0 = vrot.slane %v596_v53, 1  ;;  %3428 = vmatmul.mubr.msk.bf16.vlgmr.msra.gmra.mrb[16].mxu0 %vm4470_vm6, %v4457_v27  ;;  %v3401_v1 = vpop.f32.mrb[8].mxu0  ;;  %v4494_v4 = vpack.c.bf16 %v596_v53, %v595_v41  ;;  %v4497_v6 = vmax.f32 %v4435_v3, 0.0  ;;  %v3800_v42 = vld [vmem:[#allocation9 + $0xd8] sm:$0xff]  }
 0x1aa   : > { %3444 = vmatpush3.bf16.msra.mxu0 %v4409_v45  ;;  %v553_v8 = vadd.f32 %v3401_v1, %v4415_v47  ;;  %v544_v9 = vpop.f32.mrb[9].mxu0  ;;  %v745_v62 = vsel %vm741_vm0, %v724_v49, %v734_v57  ;;  %v755_v10 = vsel %vm741_vm0, %v734_v57, %v724_v49  ;;  %v658_v12 = vsel %vm654_vm2, %v637_v48, %v647_v56  ;;  %v3802_v57 = vld [vmem:[#allocation9 + $0x120] sm:$0xff]  }
 0x1ab   : > { %v545_v13 = vadd.f32 %v4415_v47, %v544_v9  ;;  %3445 = vmatprep.subr.bf16.mxu0 %v3779_v54  ;;  %v3402_v16 = vpop.f32.mrb[10].mxu0  ;;  %v744_v3 = vsel %vm741_vm0, %v723_v52, %v733_v0  ;;  %v754_v45 = vsel %vm741_vm0, %v733_v0, %v723_v52  ;;  %v4512_v18 = vpack.c.bf16 %v755_v10, %v745_v62 }
 0x1ac   : > { %v4514_v19 = vmax.f32 %v553_v8, 0.0  ;;  %v556_v21 = vadd.f32 %v3402_v16, %v4415_v47  ;;  %v547_v22 = vpop.f32.mrb[11].mxu0  ;;  %v4517_v23 = vpack.c.bf16 %v754_v45, %v744_v3  ;;  %v657_v24 = vsel %vm654_vm2, %v636_v51, %v646_v63  ;;  %3202 = vmatpush3.bf16.msra.mxu1 %v3791_v59 }
 0x1ad   : > { %v599_v28 = vmax.f32 %v545_v13, 0.0  ;;  %v548_v29 = vadd.f32 %v4415_v47, %v547_v22  ;;  %v667_v30 = vsel %vm654_vm2, %v646_v63, %v636_v51  ;;  %v668_v31 = vsel %vm654_vm2, %v647_v56, %v637_v48  ;;  %3203 = vmatprep.subr.bf16.mxu1 %v3794_v5 }
 0x1ae   : > { %v639_v33 = vrot.slane %v4514_v19, 7  ;;  %v726_v34 = vrot.slane %v4514_v19, 1  ;;  %v602_v35 = vmax.f32 %v556_v21, 0.0  ;;  %3446 = vmatpush3.bf16.msra.mxu0 %v3779_v54  ;;  %2916 = vmatmul.mubr.msk.bf16.gmra.mrb[8].mxu1 %vm4453_vm5, %v4482_v55  ;;  %v4531_v36 = vpack.c.bf16 %v657_v24, %v667_v30  ;;  %v3804_v21 = vld [vmem:[#allocation9 + $0xe0] sm:$0xff]  }
 0x1af   : > { %v638_v37 = vrot.slane %v599_v28, 7  ;;  %v725_v38 = vrot.slane %v599_v28, 1  ;;  %v600_v41 = vmax.f32 %v548_v29, 0.0  ;;  %3431 = vmatprep.mubr.msk.bf16.mxu0 %vm4470_vm6, %v4517_v23  ;;  %3447 = vmatprep.subr.bf16.mxu0 %v3780_v17  ;;  %v4536_v44 = vpack.c.bf16 %v658_v12, %v668_v31  ;;  %v3782_v12 = vld [vmem:[#allocation9 + $0x160] sm:$0xff]   ;;  %v3806_v29 = vld [vmem:[#allocation9 + $0x128] sm:$0xff]  }
 0x1b0   : > { %v649_v46 = vrot.slane %v602_v35, 7  ;;  %v736_v48 = vrot.slane %v602_v35, 1  ;;  %1072 = vmatprep.mubr.bf16.mxu1 %v4494_v4  ;;  %v4540_v49 = vpack.c.bf16 %v602_v35, %v4514_v19  ;;  %3204 = vmatpush3.bf16.msra.mxu1 %v3796_v25  ;;  %v653_v50 = vrot.slane %v4489_v60, 7 }
 0x1b1   : > { %v648_v51 = vrot.slane %v600_v41, 7  ;;  %v735_v52 = vrot.slane %v600_v41, 1  ;;  %3432 = vmatmul.mubr.msk.bf16.gmra.mrb[20].mxu0 %vm4470_vm6, %v4512_v18  ;;  %v3405_v53 = vpop.f32.mrb[12].mxu0  ;;  %v4546_v54 = vpack.c.bf16 %v600_v41, %v599_v28  ;;  %v740_v56 = vrot.slane %v4489_v60, 1  ;;  %3205 = vmatprep.subr.bf16.mxu1 %v3798_v32 }
 0x1b2   : > { %3448 = vmatpush3.bf16.msra.mxu0 %v3780_v17  ;;  %v569_v59 = vadd.f32 %v3405_v53, %v4415_v47  ;;  %v560_v63 = vpop.f32.mrb[13].mxu0  ;;  %v747_v0 = vsel %vm741_vm0, %v726_v34, %v736_v48  ;;  %v757_v1 = vsel %vm741_vm0, %v736_v48, %v726_v34  ;;  %v660_v5 = vsel %vm654_vm2, %v639_v33, %v649_v46 }
 0x1b3   : > { %v561_v8 = vadd.f32 %v4415_v47, %v560_v63  ;;  %3449 = vmatprep.subr.bf16.mxu0 %v3781_v43  ;;  %v3406_v9 = vpop.f32.mrb[14].mxu0  ;;  %v746_v62 = vsel %vm741_vm0, %v725_v38, %v735_v52  ;;  %v756_v10 = vsel %vm741_vm0, %v735_v52, %v725_v38  ;;  %v4561_v13 = vpack.c.bf16 %v757_v1, %v747_v0 }
 0x1b4   : > { %v605_v16 = vmax.f32 %v569_v59, 0.0  ;;  %v572_v3 = vadd.f32 %v3406_v9, %v4415_v47  ;;  %v563_v45 = vpop.f32.mrb[15].mxu0  ;;  %v4564_v17 = vpack.c.bf16 %v756_v10, %v746_v62  ;;  %v659_v19 = vsel %vm654_vm2, %v638_v37, %v648_v51  ;;  %3206 = vmatpush3.bf16.msra.mxu1 %v3800_v42  ;;  %v3808_v42 = vld [vmem:[#allocation9 + $0xe8] sm:$0xff]   ;;  %v3810_v59 = vld [vmem:[#allocation9 + $0x130] sm:$0xff]  }
 0x1b5   : > { %v603_v22 = vmax.f32 %v561_v8, 0.0  ;;  %v564_v24 = vadd.f32 %v4415_v47, %v563_v45  ;;  %v669_v25 = vsel %vm654_vm2, %v648_v51, %v638_v37  ;;  %v670_v28 = vsel %vm654_vm2, %v649_v46, %v639_v33  ;;  %3207 = vmatprep.subr.bf16.mxu1 %v3802_v57  ;;  %v3783_v33 = vld [vmem:[#allocation9 + $0x168] sm:$0xff]   ;;  %v3784_v62 = vld [vmem:[#allocation9 + $0x170] sm:$0xff]  }
 0x1b6   : > { %v641_v30 = vrot.slane %v605_v16, 7  ;;  %v728_v31 = vrot.slane %v605_v16, 1  ;;  %v606_v32 = vmax.f32 %v572_v3, 0.0  ;;  %3450 = vmatpush3.bf16.msra.mxu0 %v3781_v43  ;;  %2920 = vmatmul.mubr.msk.bf16.gmra.mrb[12].mxu1 %vm4453_vm5, %v4531_v36  ;;  %v4576_v34 = vpack.c.bf16 %v659_v19, %v669_v25  ;;  %v3812_v19 = vld [vmem:[#allocation9 + $0xf0] sm:$0xff]   ;;  %v3814_v25 = vld [vmem:[#allocation9 + $0x138] sm:$0xff]  }
 0x1b7   : > { %v640_v35 = vrot.slane %v603_v22, 7  ;;  %v727_v47 = vrot.slane %v603_v22, 1  ;;  %v604_v38 = vmax.f32 %v564_v24, 0.0  ;;  %3435 = vmatprep.mubr.msk.bf16.mxu0 %vm4470_vm6, %v4564_v17  ;;  %3451 = vmatprep.subr.bf16.mxu0 %v3782_v12  ;;  %v4581_v37 = vpack.c.bf16 %v660_v5, %v670_v28 }
 0x1b8   : > { %v651_v41 = vrot.slane %v606_v32, 7  ;;  %v738_v46 = vrot.slane %v606_v32, 1  ;;  %1080 = vmatprep.mubr.bf16.mxu1 %v4486_v58  ;;  %v652_v43 = vrot.slane %v4497_v6, 7  ;;  %v739_v48 = vrot.slane %v4497_v6, 1  ;;  %3208 = vmatpush3.bf16.msra.mxu1 %v3804_v21 }
 0x1b9   : > { %v650_v51 = vrot.slane %v604_v38, 7  ;;  %v737_v52 = vrot.slane %v604_v38, 1  ;;  %3436 = vmatmul.mubr.msk.bf16.gmra.mrb[24].mxu0 %vm4470_vm6, %v4561_v13  ;;  %v4589_v53 = vpack.c.bf16 %v604_v38, %v603_v22  ;;  %v4591_v57 = vpack.c.bf16 %v606_v32, %v605_v16  ;;  %3209 = vmatprep.subr.bf16.mxu1 %v3806_v29 }
 0x1ba   : > { %3452 = vmatpush3.bf16.msra.mxu0 %v3782_v12  ;;  %v749_v63 = vsel %vm741_vm0, %v728_v31, %v738_v46  ;;  %v759_v0 = vsel %vm741_vm0, %v738_v46, %v728_v31  ;;  %v662_v1 = vsel %vm654_vm2, %v641_v30, %v651_v41  ;;  %v672_v5 = vsel %vm654_vm2, %v651_v41, %v641_v30  ;;  %v3787_v31 = vld [vmem:[#allocation9 + $0x178] sm:$0xff]   ;;  %v3797_v41 = vld [vmem:[#allocation9 + $0x190] sm:$0xff]  }
 0x1bb   : > { %3453 = vmatprep.subr.bf16.mxu0 %v3783_v33  ;;  %v748_v8 = vsel %vm741_vm0, %v727_v47, %v737_v52  ;;  %v758_v9 = vsel %vm741_vm0, %v737_v52, %v727_v47  ;;  %v4605_v10 = vpack.c.bf16 %v759_v0, %v749_v63  ;;  %v661_v12 = vsel %vm654_vm2, %v640_v35, %v650_v51  ;;  %v3799_v46 = vld [vmem:[#allocation9 + $0x1d8] sm:$0xff]   ;;  %v3809_v52 = vld [vmem:[#allocation9 + $0x1a8] sm:$0xff]   ;;  %v3813_v63 = vld [vmem:[#allocation9 + $0x1b0] sm:$0xff]  }
 0x1bc   : > { %v4609_v16 = vpack.c.bf16 %v758_v9, %v748_v8  ;;  %v671_v3 = vsel %vm654_vm2, %v650_v51, %v640_v35  ;;  %3210 = vmatpush3.bf16.msra.mxu1 %v3808_v42  ;;  %v4613_v45 = vpack.c.bf16 %v662_v1, %v672_v5  ;;  %v750_v21 = vsel %vm741_vm0, %v729_v20, %v739_v48  ;;  %v3816_v35 = vld [vmem:[#allocation9 + $0xf8] sm:$0xff]   ;;  %v3805_v42 = vld [vmem:[#allocation9 + $0x1a0] sm:$0xff]   ;;  %v3807_v51 = vld [vmem:[#allocation9 + $0x1e8] sm:$0xff]  }
 0x1bd   : > { %v4619_v22 = vpack.c.bf16 %v661_v12, %v671_v3  ;;  %3211 = vmatprep.subr.bf16.mxu1 %v3810_v59  ;;  %v760_v24 = vsel %vm741_vm0, %v739_v48, %v729_v20  ;;  %v4627_v28 = vpack.c.bf16 %v4497_v6, %v4432_v2  ;;  %v663_v29 = vsel %vm654_vm2, %v642_v15, %v652_v43  ;;  %v3803_v48 = vld [vmem:[#allocation9 + $0x1e0] sm:$0xff]   ;;  %v3811_v59 = vld [vmem:[#allocation9 + $0x1f0] sm:$0xff]   ;;  %v3815_v0 = vld [vmem:[#allocation9 + $0x1f8] sm:$0xff]  }
 0x1be   : > { %3454 = vmatpush3.bf16.msra.mxu0 %v3783_v33  ;;  %2924 = vmatmul.mubr.msk.bf16.gmra.mrb[16].mxu1 %vm4453_vm5, %v4536_v44  ;;  %v4636_v30 = vpack.c.bf16 %v760_v24, %v750_v21  ;;  %v673_v20 = vsel %vm654_vm2, %v652_v43, %v642_v15  ;;  %v623_v6 = vpack.c.bf16 %v4489_v60, %v4426_v61  ;;  %v3788_v33 = vld [vmem:[#allocation9 + $0x1c0] sm:$0xff]   ;;  %v3801_v43 = vld [vmem:[#allocation9 + $0x198] sm:$0xff]   ;;  %v3820_v8 = vld [vmem:[#allocation9 + $0x210] sm:$0xff]  }
 0x1bf   : > { %3439 = vmatprep.mubr.msk.bf16.mxu0 %vm4470_vm6, %v4609_v16  ;;  %3455 = vmatprep.subr.bf16.mxu0 %v3784_v62  ;;  %v4647_v32 = vpack.c.bf16 %v663_v29, %v673_v20  ;;  %v4655_v2 = vsel %vm654_vm2, %v643_v7, %v653_v50  ;;  %v4663_v15 = vsel %vm654_vm2, %v653_v50, %v643_v7  ;;  %v3817_v1 = vld [vmem:[#allocation9 + $0x1b8] sm:$0xff]   ;;  %v3818_v5 = vld [vmem:[#allocation9 + $0x200] sm:$0xff]   ;;  %v3828_v60 = vld [vmem:[#allocation11 + $0x10] sm:$0xff]  }
 0x1c0   : > { %1088 = vmatprep.mubr.bf16.mxu1 %v4546_v54  ;;  %3212 = vmatpush3.bf16.msra.mxu1 %v3812_v19  ;;  %v3067_v47 = vpack.c.bf16 %v4655_v2, %v4663_v15  ;;  %v4674_v38 = vsel %vm741_vm0, %v730_v11, %v740_v56  ;;  %v4682_v7 = vsel %vm741_vm0, %v740_v56, %v730_v11  ;;  %v3792_v11 = vld [vmem:[#allocation9 + $0x1c8] sm:$0xff]   ;;  %v3795_v56 = vld [vmem:[#allocation9 + $0x1d0] sm:$0xff]   ;;  %v3826_v61 = vld [vmem:[#allocation11] sm:$0xff]  }
 0x1c1   : > { %3440 = vmatmul.mubr.msk.bf16.gmra.mrb[28].mxu0 %vm4470_vm6, %v4605_v10  ;;  %3213 = vmatprep.subr.bf16.mxu1 %v3814_v25  ;;  %v3099_v50 = vpack.c.bf16 %v4682_v7, %v4674_v38  ;;  %v3833_v3 = vld [vmem:[#allocation11 + $0x38] sm:$0xff]  }
 0x1c2   : > { %3456 = vmatpush3.bf16.msra.mxu0 %v3784_v62  ;;  %3459 = vmatprep.mubr.msk.bf16.mxu0 %vm4470_vm6, %v4457_v27  ;;  %v3793_v27 = vld [vmem:[#allocation9 + $0x188] sm:$0xff]  }
 0x1c3   : > { %3457 = vmatprep.subr.bf16.mxu0 %v3787_v31 }
 0x1c4   : > { %3214 = vmatpush3.bf16.msra.mxu1 %v3816_v35 }
 0x1c5   : > { %3507 = vmatprep.subr.bf16.mxu1 %v3826_v61 }
 0x1c6   : > { %3458 = vmatpush3.bf16.msra.mxu0 %v3787_v31  ;;  %2928 = vmatmul.mubr.msk.bf16.gmra.mrb[20].mxu1 %vm4453_vm5, %v4576_v34 }
 0x1c7   : > { %3279 = vmatprep.subr.bf16.mxu0 %v3788_v33  ;;  %1096 = vmatprep.mubr.bf16.mxu1 %v4540_v49 }
 0x1c9   : > { %3460 = vmatmul.mubr.msk.bf16.vlgmr.msra.gmra.mrb[16].mxu0 %vm4470_vm6, %v4517_v23 }
 0x1ca   : > { %3280 = vmatpush3.bf16.msra.mxu0 %v3789_v40  ;;  %3463 = vmatprep.mubr.msk.bf16.mxu0 %vm4470_vm6, %v4512_v18 }
 0x1cb   : > { %3281 = vmatprep.subr.bf16.mxu0 %v3792_v11 }
 0x1ce   : > { %3282 = vmatpush3.bf16.msra.mxu0 %v3793_v27  ;;  %2932 = vmatmul.mubr.msk.bf16.gmra.mrb[24].mxu1 %vm4453_vm5, %v4581_v37 }
 0x1cf   : > { %3283 = vmatprep.subr.bf16.mxu0 %v3795_v56  ;;  %1104 = vmatprep.mubr.bf16.mxu1 %v4589_v53 }
 0x1d1   : > { %3464 = vmatmul.mubr.msk.bf16.gmra.mrb[20].mxu0 %vm4470_vm6, %v4564_v17 }
 0x1d2   : > { %3284 = vmatpush3.bf16.msra.mxu0 %v3797_v41  ;;  %3467 = vmatprep.mubr.msk.bf16.mxu0 %vm4470_vm6, %v4561_v13 }
 0x1d3   : > { %3285 = vmatprep.subr.bf16.mxu0 %v3799_v46 }
 0x1d6   : > { %3286 = vmatpush3.bf16.msra.mxu0 %v3801_v43  ;;  %2936 = vmatmul.mubr.msk.bf16.gmra.mrb[28].mxu1 %vm4453_vm5, %v4619_v22 }
 0x1d7   : > { %3287 = vmatprep.subr.bf16.mxu0 %v3803_v48  ;;  %1112 = vmatprep.mubr.bf16.mxu1 %v4591_v57 }
 0x1d9   : > { %3468 = vmatmul.mubr.msk.bf16.gmra.mrb[24].mxu0 %vm4470_vm6, %v4609_v16 }
 0x1da   : > { %3288 = vmatpush3.bf16.msra.mxu0 %v3805_v42  ;;  %3471 = vmatprep.mubr.msk.bf16.mxu0 %vm4470_vm6, %v4605_v10 }
 0x1db   : > { %3289 = vmatprep.subr.bf16.mxu0 %v3807_v51 }
 0x1de   : > { %3290 = vmatpush3.bf16.msra.mxu0 %v3809_v52  ;;  %2940 = vmatmul.mubr.msk.bf16.gmra.mrb[32].mxu1 %vm4453_vm5, %v4613_v45 }
 0x1df   : > { %3291 = vmatprep.subr.bf16.mxu0 %v3811_v59  ;;  %1500 = vmatprep.mubr.bf16.mxu1 %v4439_v14  ;;  %v3819_v14 = vld [vmem:[#allocation9 + $0x208] sm:$0xff]  }
 0x1e1   : > { %3472 = vmatmul.mubr.msk.bf16.gmra.mrb[28].mxu0 %vm4470_vm6, %v4636_v30 }
 0x1e2   : > { %3292 = vmatpush3.bf16.msra.mxu0 %v3813_v63  ;;  %1960 = vmatprep.mubr.bf16.mxu0 %v4494_v4 }
 0x1e3   : > { %3293 = vmatprep.subr.bf16.mxu0 %v3815_v0 }
 0x1e6   : > { %3294 = vmatpush3.bf16.msra.mxu0 %v3817_v1  ;;  %2976 = vmatmul.mubr.msk.bf16.vlgmr.msra.gmra.mrb[36].mxu1 %vm4453_vm5, %v4482_v55  ;;  %v3821_v55 = vld [vmem:[#allocation9 + $0x218] sm:$0xff]  }
 0x1e7   : > { %3475 = vmatprep.subr.bf16.mxu0 %v3818_v5  ;;  %1508 = vmatprep.mubr.bf16.mxu1 %v4494_v4  ;;  %v3822_v4 = vld [vmem:[#allocation9 + $0x220] sm:$0xff]  }
 0x1e8   : > { %3508 = vmatpush3.bf16.msra.mxu1 %v3826_v61 }
 0x1e9   : > { %3040 = vmatmul.mubr.msk.bf16.vlgmr.msra.gmra.mrb[32].mxu0 %vm4453_vm5, %v4531_v36  ;;  %3509 = vmatprep.subr.bf16.mxu1 %v3827_v26 }
 0x1ea   : > { %3476 = vmatpush3.bf16.msra.mxu0 %v3818_v5  ;;  %1968 = vmatprep.mubr.bf16.mxu0 %v4486_v58 }
 0x1eb   : > { %3477 = vmatprep.subr.bf16.mxu0 %v3819_v14 }
 0x1ec   : > { %3510 = vmatpush3.bf16.msra.mxu1 %v3827_v26 }
 0x1ed   : > { %3511 = vmatprep.subr.bf16.mxu1 %v3828_v60 }
 0x1ee   : > { %2980 = vmatmul.mubr.msk.bf16.gmra.mrb[40].mxu1 %vm4453_vm5, %v4531_v36  ;;  %3478 = vmatpush3.bf16.msra.mxu0 %v3819_v14  ;;  %v3824_v36 = vld [vmem:[#allocation9 + $0x230] sm:$0xff]  }
 0x1ef   : > { %1516 = vmatprep.mubr.bf16.mxu1 %v4486_v58  ;;  %3479 = vmatprep.subr.bf16.mxu0 %v3820_v8  ;;  %v3823_v58 = vld [vmem:[#allocation9 + $0x228] sm:$0xff]  }
 0x1f0   : > { %3512 = vmatpush3.bf16.msra.mxu1 %v3828_v60 }
 0x1f1   : > { %3044 = vmatmul.mubr.msk.bf16.gmra.mrb[36].mxu0 %vm4453_vm5, %v4536_v44 }
 0x1f2   : > { %1976 = vmatprep.mubr.bf16.mxu0 %v4546_v54  ;;  %3480 = vmatpush3.bf16.msra.mxu0 %v3820_v8 }
 0x1f3   : > { %3481 = vmatprep.subr.bf16.mxu0 %v3821_v55 }
 0x1f6   : > { %2984 = vmatmul.mubr.msk.bf16.gmra.mrb[44].mxu1 %vm4453_vm5, %v4536_v44  ;;  %3482 = vmatpush3.bf16.msra.mxu0 %v3821_v55  ;;  %v3825_v44 = vld [vmem:[#allocation9 + $0x238] sm:$0xff]  }
 0x1f7   : > { %1524 = vmatprep.mubr.bf16.mxu1 %v4546_v54  ;;  %3483 = vmatprep.subr.bf16.mxu0 %v3822_v4 }
 0x1f9   : > { %3048 = vmatmul.mubr.msk.bf16.gmra.mrb[40].mxu0 %vm4453_vm5, %v4576_v34 }
 0x1fa   : > { %1984 = vmatprep.mubr.bf16.mxu0 %v4540_v49  ;;  %3484 = vmatpush3.bf16.msra.mxu0 %v3822_v4 }
 0x1fb   : > { %3485 = vmatprep.subr.bf16.mxu0 %v3823_v58 }
 0x1fe   : > { %2988 = vmatmul.mubr.msk.bf16.gmra.mrb[48].mxu1 %vm4453_vm5, %v4576_v34  ;;  %3486 = vmatpush3.bf16.msra.mxu0 %v3823_v58 }
 0x1ff   : > { %1532 = vmatprep.mubr.bf16.mxu1 %v4540_v49  ;;  %3487 = vmatprep.subr.bf16.mxu0 %v3824_v36  ;;  %v3831_v49 = vld [vmem:[#allocation11 + $0x28] sm:$0xff]  }
 0x201   : > { %3052 = vmatmul.mubr.msk.bf16.gmra.mrb[44].mxu0 %vm4453_vm5, %v4581_v37 }
 0x202   : > { %1992 = vmatprep.mubr.bf16.mxu0 %v4589_v53  ;;  %3488 = vmatpush3.bf16.msra.mxu0 %v3824_v36 }
 0x203   : > { %3489 = vmatprep.subr.bf16.mxu0 %v3825_v44 }
 0x206   : > { %2992 = vmatmul.mubr.msk.bf16.gmra.mrb[52].mxu1 %vm4453_vm5, %v4581_v37  ;;  %3490 = vmatpush3.bf16.msra.mxu0 %v3825_v44 }
 0x207   : > { %1540 = vmatprep.mubr.bf16.mxu1 %v4589_v53 }
 0x209   : > { %3056 = vmatmul.mubr.msk.bf16.gmra.mrb[48].mxu0 %vm4453_vm5, %v4619_v22 }
 0x20a   : > { %2000 = vmatprep.mubr.bf16.mxu0 %v4591_v57 }
 0x20e   : > { %2996 = vmatmul.mubr.msk.bf16.gmra.mrb[56].mxu1 %vm4453_vm5, %v4619_v22 }
 0x20f   : > { %1548 = vmatprep.mubr.bf16.mxu1 %v4591_v57 }
 0x211   : > { %3060 = vmatmul.mubr.msk.bf16.gmra.mrb[52].mxu0 %vm4453_vm5, %v4613_v45 }
 0x212   : > { %2008 = vmatprep.mubr.bf16.mxu0 %v4627_v28 }
 0x216   : > { %3000 = vmatmul.mubr.msk.bf16.gmra.mrb[60].mxu1 %vm4453_vm5, %v4613_v45 }
 0x217   : > { %1556 = vmatprep.mubr.bf16.mxu1 %v4627_v28 }
 0x219   : > { %3064 = vmatmul.mubr.msk.bf16.gmra.mrb[56].mxu0 %vm4453_vm5, %v4647_v32 }
 0x21a   : > { %2016 = vmatprep.mubr.bf16.mxu0 %v623_v6 }
 0x21e   : > { %3004 = vmatmul.mubr.msk.bf16.gmra.mrb[64].mxu1 %vm4453_vm5, %v4647_v32 }
 0x221   : > { %3068 = vmatmul.mubr.msk.bf16.gmra.mrb[60].mxu0 %vm4453_vm5, %v3067_v47 }
 0x222   : > { %3491 = vmatprep.mubr.msk.bf16.mxu0 %vm4470_vm6, %v4517_v23  ;;  %v3830_v23 = vld [vmem:[#allocation11 + $0x20] sm:$0xff]  }
 0x229   : > { %3492 = vmatmul.mubr.msk.bf16.vlgmr.msra.gmra.mrb[16].mxu0 %vm4470_vm6, %v4512_v18  ;;  %v3829_v18 = vld [vmem:[#allocation11 + $0x18] sm:$0xff]  }
 0x22a   : > { %3495 = vmatprep.mubr.msk.bf16.mxu0 %vm4470_vm6, %v4564_v17  ;;  %3513 = vmatprep.subr.bf16.mxu1 %v3829_v18 }
 0x22b   : > { %3514 = vmatpush3.bf16.msra.mxu1 %v3829_v18 }
 0x22c   : > { %3515 = vmatprep.subr.bf16.mxu1 %v3830_v23 }
 0x22f   : > { %3516 = vmatpush3.bf16.msra.mxu1 %v3830_v23 }
 0x230   : > { %3517 = vmatprep.subr.bf16.mxu1 %v3831_v49 }
 0x231   : > { %3496 = vmatmul.mubr.msk.bf16.gmra.mrb[20].mxu0 %vm4470_vm6, %v4561_v13 }
 0x232   : > { %3499 = vmatprep.mubr.msk.bf16.mxu0 %vm4470_vm6, %v4609_v16 }
 0x233   : > { %3518 = vmatpush3.bf16.msra.mxu1 %v3831_v49 }
 0x234   : > { %3519 = vmatprep.subr.bf16.mxu1 %v3832_v39 }
 0x237   : > { %3520 = vmatpush3.bf16.msra.mxu1 %v3832_v39 }
 0x238   : > { %3521 = vmatprep.subr.bf16.mxu1 %v3833_v3 }
 0x239   : > { %3500 = vmatmul.mubr.msk.bf16.gmra.mrb[24].mxu0 %vm4470_vm6, %v4605_v10 }
 0x23a   : > { %3503 = vmatprep.mubr.msk.bf16.mxu0 %vm4470_vm6, %v4636_v30 }
 0x23b   : > { %3522 = vmatpush3.bf16.msra.mxu1 %v3833_v3 }
 0x241   : > { %3504 = vmatmul.mubr.msk.bf16.gmra.mrb[28].mxu0 %vm4470_vm6, %v3099_v50 }
 0x279   : > { %v3135_v54 = vpop.f32.mrb[4].mxu1 }
 0x27a   : > { %v3136_v13 = vpop.f32.mrb[5].mxu1 }
 0x27b   : > { %v3137_v17 = vadd.f32 %v3136_v13, %v3135_v54  ;;  %v3138_v34 = vpop.f32.mrb[6].mxu1 }
 0x27c   : > { %v3139_v37 = vpop.f32.mrb[7].mxu1 }
 0x27d   : > { %v3140_v53 = vadd.f32 %v3139_v37, %v3138_v34 }
 0x281   : > { %v3141_v57 = vpop.f32.mrb[8].mxu1 }
 0x282   : > { %v3142_v9 = vpop.f32.mrb[9].mxu1 }
 0x283   : > { %v4822_v62 = vadd.f32 %v3142_v9, %v3141_v57  ;;  %v3144_v10 = vpop.f32.mrb[10].mxu1 }
 0x284   : > { %v3145_v12 = vpop.f32.mrb[11].mxu1 }
 0x285   : > { %v4824_v16 = vadd.f32 %v3145_v12, %v3144_v10 }
 0x289   : > { %v3147_v45 = vpop.f32.mrb[12].mxu1 }
 0x28a   : > { %v3148_v19 = vpop.f32.mrb[13].mxu1 }
 0x28b   : > { %v4826_v21 = vadd.f32 %v3148_v19, %v3147_v45  ;;  %v3150_v22 = vpop.f32.mrb[14].mxu1 }
 0x28c   : > { %v3151_v24 = vpop.f32.mrb[15].mxu1 }
 0x28d   : > { %v4828_v25 = vadd.f32 %v3151_v24, %v3150_v22 }
 0x291   : > { %v3153_v28 = vpop.f32.mrb[16].mxu1 }
 0x292   : > { %v3154_v29 = vpop.f32.mrb[17].mxu1 }
 0x293   : > { %v4830_v30 = vadd.f32 %v3154_v29, %v3153_v28  ;;  %v3156_v20 = vpop.f32.mrb[18].mxu1 }
 0x294   : > { %v3157_v6 = vpop.f32.mrb[19].mxu1 }
 0x295   : > { %v4832_v31 = vadd.f32 %v3157_v6, %v3156_v20 }
 0x299   : > { %v3159_v32 = vpop.f32.mrb[20].mxu1 }
 0x29a   : > { %v3160_v2 = vpop.f32.mrb[21].mxu1 }
 0x29b   : > { %v4834_v15 = vadd.f32 %v3160_v2, %v3159_v32  ;;  %v3162_v35 = vpop.f32.mrb[22].mxu1 }
 0x29c   : > { %v3163_v47 = vpop.f32.mrb[23].mxu1 }
 0x29d   : > { %v4836_v38 = vadd.f32 %v3163_v47, %v3162_v35 }
 0x2a1   : > { %v3165_v7 = vpop.f32.mrb[24].mxu1 }
 0x2a2   : > { %v3166_v50 = vpop.f32.mrb[25].mxu1 }
 0x2a3   : > { %v4838_v33 = vadd.f32 %v3166_v50, %v3165_v7  ;;  %v3168_v40 = vpop.f32.mrb[26].mxu1 }
 0x2a4   : > { %v3169_v11 = vpop.f32.mrb[27].mxu1 }
 0x2a5   : > { %v4840_v27 = vadd.f32 %v3169_v11, %v3168_v40 }
 0x2a9   : > { %v3171_v56 = vpop.f32.mrb[28].mxu1 }
 0x2aa   : > { %v3172_v41 = vpop.f32.mrb[29].mxu1 }
 0x2ab   : > { %v4842_v46 = vadd.f32 %v3172_v41, %v3171_v56  ;;  %v3174_v43 = vpop.f32.mrb[30].mxu1 }
 0x2ac   : > { %v3175_v48 = vpop.f32.mrb[31].mxu1 }
 0x2ad   : > { %v4844_v42 = vadd.f32 %v3175_v48, %v3174_v43 }
 0x2b1   : > { %v3177_v51 = vpop.f32.mrb[32].mxu1 }
 0x2b2   : > { %v3178_v52 = vpop.f32.mrb[33].mxu1 }
 0x2b3   : > { %v4846_v59 = vadd.f32 %v3178_v52, %v3177_v51  ;;  %v3180_v63 = vpop.f32.mrb[34].mxu1 }
 0x2b4   : > { %v3181_v0 = vpop.f32.mrb[35].mxu1 }
 0x2b5   : > { %v4848_v1 = vadd.f32 %v3181_v0, %v3180_v63 }
 0x2b9   : > { %v3215_v5 = vpop.f32.mrb[36].mxu1 }
 0x2ba   : > { %v3216_v14 = vpop.f32.mrb[37].mxu1 }
 0x2bb   : > { %v3217_v8 = vadd.f32 %v3216_v14, %v3215_v5  ;;  %v3218_v55 = vpop.f32.mrb[38].mxu1 }
 0x2bc   : > { %v3295_v4 = vpop.f32.mrb[32].mxu0  ;;  %v3219_v58 = vpop.f32.mrb[39].mxu1 }
 0x2bd   : > { %v3558_v36 = vadd.f32 %v3217_v8, %v3137_v17  ;;  %v3296_v44 = vpop.f32.mrb[33].mxu0  ;;  %v3220_v61 = vadd.f32 %v3219_v58, %v3218_v55 }
 0x2be   : > { %v3297_v26 = vadd.f32 %v3296_v44, %v3295_v4  ;;  %v3298_v60 = vpop.f32.mrb[34].mxu0 }
 0x2bf   : > { %v3564_v18 = vadd.f32 %v3220_v61, %v3140_v53  ;;  %v3299_v23 = vpop.f32.mrb[35].mxu0 }
 0x2c0   : > { %v3300_v49 = vadd.f32 %v3299_v23, %v3298_v60  ;;  %v4850_v39 = vadd.f32 %v3558_v36, %v3297_v26 }
 0x2c1   : > { %v3221_v54 = vpop.f32.mrb[40].mxu1 }
 0x2c2   : > { %v3222_v13 = vpop.f32.mrb[41].mxu1  ;;  %v4852_v34 = vadd.f32 %v3564_v18, %v3300_v49 }
 0x2c3   : > { %v3223_v37 = vadd.f32 %v3222_v13, %v3221_v54  ;;  %v3224_v57 = vpop.f32.mrb[42].mxu1 }
 0x2c4   : > { %v3301_v9 = vpop.f32.mrb[36].mxu0  ;;  %v3225_v10 = vpop.f32.mrb[43].mxu1 }
 0x2c5   : > { %v3555_v12 = vadd.f32 %v3223_v37, %v4822_v62  ;;  %v3302_v17 = vpop.f32.mrb[37].mxu0  ;;  %v3226_v3 = vadd.f32 %v3225_v10, %v3224_v57 }
 0x2c6   : > { %v3303_v45 = vadd.f32 %v3302_v17, %v3301_v9  ;;  %v3304_v19 = vpop.f32.mrb[38].mxu0 }
 0x2c7   : > { %v3561_v53 = vadd.f32 %v3226_v3, %v4824_v16  ;;  %v3305_v22 = vpop.f32.mrb[39].mxu0 }
 0x2c8   : > { %v3306_v24 = vadd.f32 %v3305_v22, %v3304_v19  ;;  %v4856_v28 = vadd.f32 %v3555_v12, %v3303_v45 }
 0x2c9   : > { %v3227_v29 = vpop.f32.mrb[44].mxu1 }
 0x2ca   : > { %v3228_v20 = vpop.f32.mrb[45].mxu1  ;;  %v4858_v6 = vadd.f32 %v3561_v53, %v3306_v24 }
 0x2cb   : > { %v3229_v32 = vadd.f32 %v3228_v20, %v3227_v29  ;;  %v3230_v2 = vpop.f32.mrb[46].mxu1 }
 0x2cc   : > { %v3307_v35 = vpop.f32.mrb[40].mxu0  ;;  %v3231_v47 = vpop.f32.mrb[47].mxu1 }
 0x2cd   : > { %v3570_v62 = vadd.f32 %v3229_v32, %v4826_v21  ;;  %v3308_v7 = vpop.f32.mrb[41].mxu0  ;;  %v3232_v50 = vadd.f32 %v3231_v47, %v3230_v2 }
 0x2ce   : > { %v3309_v40 = vadd.f32 %v3308_v7, %v3307_v35  ;;  %v3310_v11 = vpop.f32.mrb[42].mxu0 }
 0x2cf   : > { %v3576_v16 = vadd.f32 %v3232_v50, %v4828_v25  ;;  %v3311_v56 = vpop.f32.mrb[43].mxu0 }
 0x2d0   : > { %v3312_v41 = vadd.f32 %v3311_v56, %v3310_v11  ;;  %v4862_v43 = vadd.f32 %v3570_v62, %v3309_v40 }
 0x2d1   : > { %v3233_v48 = vpop.f32.mrb[48].mxu1 }
 0x2d2   : > { %v3234_v51 = vpop.f32.mrb[49].mxu1  ;;  %v4864_v52 = vadd.f32 %v3576_v16, %v3312_v41 }
 0x2d3   : > { %v3235_v63 = vadd.f32 %v3234_v51, %v3233_v48  ;;  %v3236_v0 = vpop.f32.mrb[50].mxu1 }
 0x2d4   : > { %v3313_v5 = vpop.f32.mrb[44].mxu0  ;;  %v3237_v14 = vpop.f32.mrb[51].mxu1 }
 0x2d5   : > { %v3567_v21 = vadd.f32 %v3235_v63, %v4830_v30  ;;  %v3314_v8 = vpop.f32.mrb[45].mxu0  ;;  %v3238_v55 = vadd.f32 %v3237_v14, %v3236_v0 }
 0x2d6   : > { %v3315_v4 = vadd.f32 %v3314_v8, %v3313_v5  ;;  %v3316_v58 = vpop.f32.mrb[46].mxu0 }
 0x2d7   : > { %v3573_v25 = vadd.f32 %v3238_v55, %v4832_v31  ;;  %v3317_v36 = vpop.f32.mrb[47].mxu0 }
 0x2d8   : > { %v3318_v44 = vadd.f32 %v3317_v36, %v3316_v58  ;;  %v4868_v61 = vadd.f32 %v3567_v21, %v3315_v4 }
 0x2d9   : > { %v3239_v26 = vpop.f32.mrb[52].mxu1 }
 0x2da   : > { %v3240_v60 = vpop.f32.mrb[53].mxu1  ;;  %v4870_v18 = vadd.f32 %v3573_v25, %v3318_v44 }
 0x2db   : > { %v3241_v23 = vadd.f32 %v3240_v60, %v3239_v26  ;;  %v3242_v49 = vpop.f32.mrb[54].mxu1 }
 0x2dc   : > { %v3319_v54 = vpop.f32.mrb[48].mxu0  ;;  %v3243_v13 = vpop.f32.mrb[55].mxu1 }
 0x2dd   : > { %v3582_v30 = vadd.f32 %v3241_v23, %v4834_v15  ;;  %v3320_v37 = vpop.f32.mrb[49].mxu0  ;;  %v3244_v57 = vadd.f32 %v3243_v13, %v3242_v49 }
 0x2de   : > { %v3321_v9 = vadd.f32 %v3320_v37, %v3319_v54  ;;  %v3322_v10 = vpop.f32.mrb[50].mxu0 }
 0x2df   : > { %v3588_v31 = vadd.f32 %v3244_v57, %v4836_v38  ;;  %v3323_v12 = vpop.f32.mrb[51].mxu0 }
 0x2e0   : > { %v3324_v17 = vadd.f32 %v3323_v12, %v3322_v10  ;;  %v4874_v3 = vadd.f32 %v3582_v30, %v3321_v9 }
 0x2e1   : > { %v3245_v45 = vpop.f32.mrb[56].mxu1 }
 0x2e2   : > { %v3246_v19 = vpop.f32.mrb[57].mxu1  ;;  %v4876_v53 = vadd.f32 %v3588_v31, %v3324_v17  ;;  %v4897_v31 = vld [vmem:[%s5037_s5] ss:$0 sm:$0xff] }
 0x2e3   : > { %v3247_v22 = vadd.f32 %v3246_v19, %v3245_v45  ;;  %v3248_v24 = vpop.f32.mrb[58].mxu1 }
 0x2e4   : > { %v3325_v29 = vpop.f32.mrb[52].mxu0  ;;  %v3249_v20 = vpop.f32.mrb[59].mxu1 }
 0x2e5   : > { %v3579_v15 = vadd.f32 %v3247_v22, %v4838_v33  ;;  %v3326_v32 = vpop.f32.mrb[53].mxu0  ;;  %v3250_v2 = vadd.f32 %v3249_v20, %v3248_v24 }
 0x2e6   : > { %v3327_v35 = vadd.f32 %v3326_v32, %v3325_v29  ;;  %v3328_v47 = vpop.f32.mrb[54].mxu0 }
 0x2e7   : > { %v3585_v38 = vadd.f32 %v3250_v2, %v4840_v27  ;;  %v3329_v62 = vpop.f32.mrb[55].mxu0 }
 0x2e8   : > { %v3330_v7 = vadd.f32 %v3329_v62, %v3328_v47  ;;  %v4880_v50 = vadd.f32 %v3579_v15, %v3327_v35 }
 0x2e9   : > { %v3251_v40 = vpop.f32.mrb[60].mxu1 }
 0x2ea   : > { %v3252_v11 = vpop.f32.mrb[61].mxu1  ;;  %v4882_v16 = vadd.f32 %v3585_v38, %v3330_v7 }
 0x2eb   : > { %v3253_v56 = vadd.f32 %v3252_v11, %v3251_v40  ;;  %v3254_v41 = vpop.f32.mrb[62].mxu1 }
 0x2ec   : > { %v3331_v48 = vpop.f32.mrb[56].mxu0  ;;  %v3255_v51 = vpop.f32.mrb[63].mxu1 }
 0x2ed   : > { %v3594_v33 = vadd.f32 %v3253_v56, %v4842_v46  ;;  %v3332_v63 = vpop.f32.mrb[57].mxu0  ;;  %v3256_v0 = vadd.f32 %v3255_v51, %v3254_v41 }
 0x2ee   : > { %v3333_v5 = vadd.f32 %v3332_v63, %v3331_v48  ;;  %v3334_v14 = vpop.f32.mrb[58].mxu0 }
 0x2ef   : > { %v3600_v27 = vadd.f32 %v3256_v0, %v4844_v42  ;;  %v3335_v21 = vpop.f32.mrb[59].mxu0 }
 0x2f0   : > { %v3336_v8 = vadd.f32 %v3335_v21, %v3334_v14  ;;  %v4886_v55 = vadd.f32 %v3594_v33, %v3333_v5 }
 0x2f1   : > { %v3257_v4 = vpop.f32.mrb[64].mxu1 }
 0x2f2   : > { %v3258_v58 = vpop.f32.mrb[65].mxu1  ;;  %v4888_v25 = vadd.f32 %v3600_v27, %v3336_v8 }
 0x2f3   : > { %v3259_v36 = vadd.f32 %v3258_v58, %v3257_v4  ;;  %v3260_v44 = vpop.f32.mrb[66].mxu1 }
 0x2f4   : > { %v3337_v26 = vpop.f32.mrb[60].mxu0  ;;  %v3261_v60 = vpop.f32.mrb[67].mxu1 }
 0x2f5   : > { %v3591_v46 = vadd.f32 %v3259_v36, %v4846_v59  ;;  %v3338_v23 = vpop.f32.mrb[61].mxu0  ;;  %v3262_v49 = vadd.f32 %v3261_v60, %v3260_v44 }
 0x2f6   : > { %v3339_v54 = vadd.f32 %v3338_v23, %v3337_v26  ;;  %v3340_v13 = vpop.f32.mrb[62].mxu0 }
 0x2f7   : > { %v3597_v42 = vadd.f32 %v3262_v49, %v4848_v1  ;;  %v3341_v30 = vpop.f32.mrb[63].mxu0 }
 0x2f8   : > { %v3342_v37 = vadd.f32 %v3341_v30, %v3340_v13  ;;  %v3592_v57 = vadd.f32 %v3591_v46, %v3339_v54 }
 0x2fa   : > { %v4892_v9 = vadd.f32 %v3597_v42, %v3342_v37 }
 0x2fc   : > { %v3493_v10 = vpop.f32.mrb[16].mxu0 }
 0x2fd   : > { %v3557_v12 = vadd.f32 %v4856_v28, %v3493_v10  ;;  %v2059_v59 = vpop.f32.mrb[17].mxu0 }
 0x2fe   : > { %v3560_v17 = vadd.f32 %v4850_v39, %v2059_v59  ;;  %v3494_v45 = vpop.f32.mrb[18].mxu0 }
 0x2ff   : > { %v2179_v19 = vadd.f32 %v3557_v12, %v4897_v31  ;;  %v3563_v1 = vadd.f32 %v4858_v6, %v3494_v45  ;;  %v2062_v22 = vpop.f32.mrb[19].mxu0 }
 0x300   : > { %v2177_v24 = vadd.f32 %v3560_v17, %v4897_v31  ;;  %v3566_v29 = vadd.f32 %v4852_v34, %v2062_v22 }
 0x301   : > { %v2180_v20 = vadd.f32 %v3563_v1, %v4897_v31  ;;  %v2195_v32 = vmax.f32 %v2179_v19, 0.0 }
 0x302   : > { %v2178_v15 = vadd.f32 %v3566_v29, %v4897_v31  ;;  %v2193_v28 = vmax.f32 %v2177_v24, 0.0 }
 0x303   : > { %v2196_v2 = vmax.f32 %v2180_v20, 0.0 }
 0x304   : > { %v2194_v35 = vmax.f32 %v2178_v15, 0.0  ;;  %v3497_v47 = vpop.f32.mrb[20].mxu0  ;;  %v2805_v15 = vld [vmem:[%s4323_s18 + $0x8] sm:$0xff] }
 0x305   : > { %v2210_v39 = vpack.c.bf16 %v2196_v2, %v2195_v32  ;;  %v3569_v38 = vadd.f32 %v4868_v61, %v3497_v47  ;;  %v2075_v62 = vpop.f32.mrb[21].mxu0 }
 0x306   : > { %v3572_v6 = vadd.f32 %v4862_v43, %v2075_v62  ;;  %v3498_v7 = vpop.f32.mrb[22].mxu0  ;;  %v2209_v40 = vpack.c.bf16 %v2194_v35, %v2193_v28  ;;  %v2397_v62 = vunpack.c.h.bf16 %v2805_v15 }
 0x307   : > { %v2183_v11 = vadd.f32 %v3569_v38, %v4897_v31  ;;  %v3575_v34 = vadd.f32 %v4870_v18, %v3498_v7  ;;  %v2078_v56 = vpop.f32.mrb[23].mxu0 }
 0x308   : > { %v2181_v41 = vadd.f32 %v3572_v6, %v4897_v31  ;;  %v3578_v48 = vadd.f32 %v4864_v52, %v2078_v56  ;;  %3523 = vmatprep.mubr.bf16.mxu1 %v2209_v40  ;;  %v2808_v56 = vld [vmem:[%s4323_s18 + $0x20] sm:$0xff] }
 0x309   : > { %v2184_v51 = vadd.f32 %v3575_v34, %v4897_v31  ;;  %3524 = vmatmul.mubr.bf16.vlgmr.msra.gmra.mrb[68].mxu1 %v2210_v39  ;;  %v2199_v33 = vmax.f32 %v2183_v11, 0.0 }
 0x30a   : > { %v2182_v61 = vadd.f32 %v3578_v48, %v4897_v31  ;;  %v2197_v43 = vmax.f32 %v2181_v41, 0.0  ;;  %v2807_v48 = vld [vmem:[%s4323_s18 + $0x18] sm:$0xff] }
 0x30b   : > { %v2200_v63 = vmax.f32 %v2184_v51, 0.0 }
 0x30c   : > { %v2198_v0 = vmax.f32 %v2182_v61, 0.0  ;;  %v3501_v5 = vpop.f32.mrb[24].mxu0 }
 0x30d   : > { %v3581_v14 = vadd.f32 %v4880_v50, %v3501_v5  ;;  %v2091_v27 = vpop.f32.mrb[25].mxu0  ;;  %v2212_v18 = vpack.c.bf16 %v2200_v63, %v2199_v33  ;;  %v2402_v63 = vunpack.c.l.bf16 %v2808_v56 }
 0x30e   : > { %v3584_v21 = vadd.f32 %v4874_v3, %v2091_v27  ;;  %v3502_v8 = vpop.f32.mrb[26].mxu0  ;;  %v2211_v4 = vpack.c.bf16 %v2198_v0, %v2197_v43 }
 0x30f   : > { %v2187_v52 = vadd.f32 %v3581_v14, %v4897_v31  ;;  %v3587_v58 = vadd.f32 %v4882_v16, %v3502_v8  ;;  %v2094_v36 = vpop.f32.mrb[27].mxu0  ;;  %v2400_v14 = vunpack.c.l.bf16 %v2807_v48  ;;  %v2403_v8 = vunpack.c.h.bf16 %v2808_v56 }
 0x310   : > { %v2185_v44 = vadd.f32 %v3584_v21, %v4897_v31  ;;  %v3590_v26 = vadd.f32 %v4876_v53, %v2094_v36  ;;  %3527 = vmatprep.mubr.bf16.mxu1 %v2211_v4  ;;  %v2401_v36 = vunpack.c.h.bf16 %v2807_v48 }
 0x311   : > { %v2188_v60 = vadd.f32 %v3587_v58, %v4897_v31  ;;  %3528 = vmatmul.mubr.bf16.gmra.mrb[72].mxu1 %v2212_v18  ;;  %v2203_v46 = vmax.f32 %v2187_v52, 0.0 }
 0x312   : > { %v2186_v50 = vadd.f32 %v3590_v26, %v4897_v31  ;;  %v2201_v3 = vmax.f32 %v2185_v44, 0.0 }
 0x313   : > { %v2204_v23 = vmax.f32 %v2188_v60, 0.0 }
 0x314   : > { %v2202_v49 = vmax.f32 %v2186_v50, 0.0  ;;  %v3505_v54 = vpop.f32.mrb[28].mxu0 }
 0x315   : > { %v3593_v13 = vadd.f32 %v3592_v57, %v3505_v54  ;;  %v2107_v42 = vpop.f32.mrb[29].mxu0  ;;  %v2214_v30 = vpack.c.bf16 %v2204_v23, %v2203_v46  ;;  %v2810_v23 = vld [vmem:[%s4323_s18 + $0x30] sm:$0xff] }
 0x316   : > { %v3596_v16 = vadd.f32 %v4886_v55, %v2107_v42  ;;  %v3506_v37 = vpop.f32.mrb[30].mxu0  ;;  %v2213_v10 = vpack.c.bf16 %v2202_v49, %v2201_v3  ;;  %v2809_v49 = vld [vmem:[%s4323_s18 + $0x28] sm:$0xff] }
 0x317   : > { %v2191_v53 = vadd.f32 %v3593_v13, %v4897_v31  ;;  %v3599_v12 = vadd.f32 %v4892_v9, %v3506_v37  ;;  %v2110_v59 = vpop.f32.mrb[31].mxu0  ;;  %v2806_v9 = vld [vmem:[%s4323_s18 + $0x10] sm:$0xff] }
 0x318   : > { %v2189_v17 = vadd.f32 %v3596_v16, %v4897_v31  ;;  %v3602_v45 = vadd.f32 %v4888_v25, %v2110_v59  ;;  %3531 = vmatprep.mubr.bf16.mxu1 %v2213_v10  ;;  %v4935_v25 = vld [vmem:[%s5038_s6] ss:$0 sm:$0xff]  ;;  %v2398_v32 = vunpack.c.l.bf16 %v2806_v9  ;;  %v2399_v47 = vunpack.c.h.bf16 %v2806_v9 }
 0x319   : > { %v2192_v57 = vadd.f32 %v3599_v12, %v4897_v31  ;;  %3532 = vmatmul.mubr.bf16.gmra.mrb[76].mxu1 %v2214_v30  ;;  %v2207_v55 = vmax.f32 %v2191_v53, 0.0  ;;  %v2406_v30 = vunpack.c.l.bf16 %v2810_v23  ;;  %v2404_v53 = vunpack.c.l.bf16 %v2809_v49 }
 0x31a   : > { %v2190_v19 = vadd.f32 %v3602_v45, %v4897_v31  ;;  %v2205_v22 = vmax.f32 %v2189_v17, 0.0  ;;  %v2396_v31 = vunpack.c.l.bf16 %v2805_v15  ;;  %v2407_v45 = vunpack.c.h.bf16 %v2810_v23  ;;  %v2812_v15 = vld [vmem:[%s4323_s18 + $0x40] sm:$0xff] }
 0x31b   : > { %v2208_v1 = vmax.f32 %v2192_v57, 0.0 }
 0x31c   : > { %v2206_v24 = vmax.f32 %v2190_v19, 0.0 }
 0x31d   : > { %v2216_v29 = vpack.c.bf16 %v2208_v1, %v2207_v55  ;;  %v2405_v1 = vunpack.c.h.bf16 %v2809_v49 }
 0x31e   : > { %v2215_v20 = vpack.c.bf16 %v2206_v24, %v2205_v22 }
 0x320   : > { %3535 = vmatprep.mubr.bf16.mxu1 %v2215_v20 }
 0x321   : > { %3536 = vmatmul.mubr.bf16.gmra.mrb[80].mxu1 %v2216_v29 }
 0x3dc   : > { %v3525_v2 = vpop.f32.mrb[68].mxu1 }
 0x3dd   : > { %v2331_v28 = vadd.f32 %v3525_v2, %v4935_v25  ;;  %v2322_v35 = vpop.f32.mrb[69].mxu1  ;;  %v2811_v2 = vld [vmem:[%s4323_s18 + $0x38] sm:$0xff]  ;;  %s5078_s18 = sshll.u32 %s4067_s28, 4 }
 0x3de   : > { %v2323_v39 = vadd.f32 %v4935_v25, %v2322_v35  ;;  %v3526_v38 = vpop.f32.mrb[70].mxu1  ;;  %s2539_s12 = sadd.s32 %s5078_s18, %s2832_s26 }
 0x3df   : > { %v2414_v6 = vadd.f32 %v2398_v32, %v2331_v28  ;;  %v2334_v7 = vadd.f32 %v3526_v38, %v4935_v25  ;;  %v2325_v40 = vpop.f32.mrb[71].mxu1  ;;  %s2833_s27 = sshll.u32 %s2539_s12, 6 }
 0x3e0   : > { %v2412_v11 = vadd.f32 %v2396_v31, %v2323_v39  ;;  %v2326_v34 = vadd.f32 %v4935_v25, %v2325_v40  ;;  %s4972_s30 = scalar_lea.hbm %s5039_s7, %s2833_s27 }
 0x3e1   : > { %v2415_v41 = vadd.f32 %v2399_v47, %v2334_v7  ;;  %v2430_v61 = vmax.f32 %v2414_v6, 0.0  ;;  %v2410_v47 = vunpack.c.l.bf16 %v2812_v15  ;;  %v2408_v6 = vunpack.c.l.bf16 %v2811_v2 }
 0x3e2   : > { %v2413_v51 = vadd.f32 %v2397_v62, %v2326_v34  ;;  %v2428_v43 = vmax.f32 %v2412_v11, 0.0  ;;  %v2411_v34 = vunpack.c.h.bf16 %v2812_v15 }
 0x3e3   : > { %v2431_v33 = vmax.f32 %v2415_v41, 0.0 }
 0x3e4   : > { %v2429_v0 = vmax.f32 %v2413_v51, 0.0  ;;  %v3529_v5 = vpop.f32.mrb[72].mxu1  ;;  %v2409_v51 = vunpack.c.h.bf16 %v2811_v2 }
 0x3e5   : > { %v2870_v27 = vpack.c.bf16 %v2431_v33, %v2430_v61  ;;  %v2347_v18 = vadd.f32 %v3529_v5, %v4935_v25  ;;  %v2338_v21 = vpop.f32.mrb[73].mxu1 }
 0x3e6   : > { %v2865_v4 = vpack.c.bf16 %v2429_v0, %v2428_v43  ;;  %v2339_v52 = vadd.f32 %v4935_v25, %v2338_v21  ;;  %v3530_v58 = vpop.f32.mrb[74].mxu1 }
 0x3e7   : > { %2902 = vst [vmem:[%s4390_s13 + $0x8] sm:$0xff] %v2870_v27   ;;  %v2418_v44 = vadd.f32 %v2402_v63, %v2347_v18  ;;  %v2350_v26 = vadd.f32 %v3530_v58, %v4935_v25  ;;  %v2341_v60 = vpop.f32.mrb[75].mxu1 }
 0x3e8   : > { %2866 = vst [vmem:[%s4390_s13] sm:$0xff] %v2865_v4   ;;  %v2416_v50 = vadd.f32 %v2400_v14, %v2339_v52  ;;  %v2342_v46 = vadd.f32 %v4935_v25, %v2341_v60 }
 0x3e9   : > { %v2419_v3 = vadd.f32 %v2403_v8, %v2350_v26  ;;  %v2434_v13 = vmax.f32 %v2418_v44, 0.0 }
 0x3ea   : > { %v2417_v54 = vadd.f32 %v2401_v36, %v2342_v46  ;;  %v2432_v16 = vmax.f32 %v2416_v50, 0.0 }
 0x3eb   : > { %v2435_v42 = vmax.f32 %v2419_v3, 0.0 }
 0x3ec   : > { %v2433_v37 = vmax.f32 %v2417_v54, 0.0  ;;  %v3533_v10 = vpop.f32.mrb[76].mxu1 }
 0x3ed   : > { %v2880_v12 = vpack.c.bf16 %v2435_v42, %v2434_v13  ;;  %v2363_v59 = vadd.f32 %v3533_v10, %v4935_v25  ;;  %v2354_v17 = vpop.f32.mrb[77].mxu1 }
 0x3ee   : > { %v2875_v57 = vpack.c.bf16 %v2433_v37, %v2432_v16  ;;  %v2355_v19 = vadd.f32 %v4935_v25, %v2354_v17  ;;  %v3534_v55 = vpop.f32.mrb[78].mxu1 }
 0x3ef   : > { %2904 = vst [vmem:[%s4390_s13 + $0x18] sm:$0xff] %v2880_v12   ;;  %v2422_v22 = vadd.f32 %v2406_v30, %v2363_v59  ;;  %v2366_v24 = vadd.f32 %v3534_v55, %v4935_v25  ;;  %v2357_v29 = vpop.f32.mrb[79].mxu1 }
 0x3f0   : > { %2903 = vst [vmem:[%s4390_s13 + $0x10] sm:$0xff] %v2875_v57   ;;  %v2420_v20 = vadd.f32 %v2404_v53, %v2355_v19  ;;  %v2358_v9 = vadd.f32 %v4935_v25, %v2357_v29 }
 0x3f1   : > { %v2423_v32 = vadd.f32 %v2407_v45, %v2366_v24  ;;  %v2438_v28 = vmax.f32 %v2422_v22, 0.0 }
 0x3f2   : > { %v2421_v31 = vadd.f32 %v2405_v1, %v2358_v9  ;;  %v2436_v39 = vmax.f32 %v2420_v20, 0.0 }
 0x3f3   : > { %v2439_v35 = vmax.f32 %v2423_v32, 0.0 }
 0x3f4   : > { %v2437_v38 = vmax.f32 %v2421_v31, 0.0  ;;  %v3537_v62 = vpop.f32.mrb[80].mxu1 }
 0x3f5   : > { %v2890_v7 = vpack.c.bf16 %v2439_v35, %v2438_v28  ;;  %v2379_v40 = vadd.f32 %v3537_v62, %v4935_v25  ;;  %v2370_v11 = vpop.f32.mrb[81].mxu1 }
 0x3f6   : > { %v2885_v56 = vpack.c.bf16 %v2437_v38, %v2436_v39  ;;  %v2371_v41 = vadd.f32 %v4935_v25, %v2370_v11  ;;  %v3538_v48 = vpop.f32.mrb[82].mxu1 }
 0x3f7   : > { %2906 = vst [vmem:[%s4390_s13 + $0x28] sm:$0xff] %v2890_v7   ;;  %v2426_v61 = vadd.f32 %v2410_v47, %v2379_v40  ;;  %v2382_v33 = vadd.f32 %v3538_v48, %v4935_v25  ;;  %v2373_v63 = vpop.f32.mrb[83].mxu1 }
 0x3f8   : > { %2905 = vst [vmem:[%s4390_s13 + $0x20] sm:$0xff] %v2885_v56   ;;  %v2424_v43 = vadd.f32 %v2408_v6, %v2371_v41  ;;  %v2374_v0 = vadd.f32 %v4935_v25, %v2373_v63 }
 0x3f9   : > { %v2427_v5 = vadd.f32 %v2411_v34, %v2382_v33  ;;  %v2442_v27 = vmax.f32 %v2426_v61, 0.0 }
 0x3fa   : > { %v2425_v14 = vadd.f32 %v2409_v51, %v2374_v0  ;;  %v2440_v21 = vmax.f32 %v2424_v43, 0.0 }
 0x3fb   : > { %v2443_v18 = vmax.f32 %v2427_v5, 0.0 }
 0x3fc   : > { %v2441_v8 = vmax.f32 %v2425_v14, 0.0 }
 0x3fd   : > { %v2900_v4 = vpack.c.bf16 %v2443_v18, %v2442_v27 }
 0x3fe   : > { %v2895_v25 = vpack.c.bf16 %v2441_v8, %v2440_v21 }
 0x3ff   : > { %2908 = vst [vmem:[%s4390_s13 + $0x38] sm:$0xff] %v2900_v4  }
 0x400   : > { %2907 = vst [vmem:[%s4390_s13 + $0x30] sm:$0xff] %v2895_v25  }
 0x401   : > { %3988 = shalt.err (!%p3985_p2)
}
 0x402   : > { %s3989_s13 = scalar_lea.hbm %s4972_s30, 1024  ;;  %s3993_s20 = scalar_lea.hbm %s5039_s7, 4096 }
 0x403   : > { %p3990_p8 = scmp.ne.s32.totalorder %s4972_s30, %s3989_s13  ;;  %p3994_p4 = scmp.lt.u32.totalorder %s4972_s30, %s5039_s7 }
 0x404   : > { %p3995_p5 = scmp.lt.u32.totalorder %s3993_s20, %s3989_s13  ;;  %p3997_p1 = scmp.lt.u32.totalorder %s3989_s13, %s4972_s30 }
 0x405   : > { %p3991_p10 = pnand %p3990_p8, %p5080_p6 }
 0x406   : > { %p3996_p0 = por %p3995_p5, %p3994_p4 }
 0x407   : > { %p3992_p12 = pneg %p3991_p10 }
 0x408   : > { %p3998_p7 = por %p3997_p1, %p3996_p0 }
 0x40a   : > { %p3999_p9 = pnand %p3998_p7, %p3992_p12 }
 0x40c   : > { %4002 = shalt.err (!%p3999_p9)
}
 0x40d   : > { %s4089_s26 = smov 64   ;;  %s4090_s18 = smov 4  }
 0x40e   : > { %3649 = dma.vmem_to_hbm [thread:$0]  (%p5080_p6), %s4974_s16, 1024, %s4972_s30, %s4980_s22, %s4089_s26, %s4089_s26, %s4090_s18  }
 0x40f PF: > { %s5081_s12 = sld [smem:[#allocation25_spill]]  ;;  %s5082_s27 = sld [smem:[#allocation31_spill]] }
 0x410   : > { %p3673_p11 = scmp.ge.s32.totalorder %s4079_s8, 2 }
 0x415   : > { %s2557_s21 = sand.u32 1, %s5081_s12   ;;  %p5083_p13 = scmp.ne.s32.totalorder %s5082_s27, 0 }
 0x416   : > { %s2558_s28 = scalar_lea.sflag [#allocation8], %s2557_s21 }
 0x417   : > { %p3662_p3 = pnand %p3673_p11, %p5083_p13 }
 0x419   : > { %4046 = dma.done.wait (!%p3662_p3), %s2558_s28, 1024  }
 0x41a   : > { %4048 = vsyncadd (!%p3662_p3), %s2558_s28, 4294966272  ;;  %s22_s8 = sadd.s32 1, %s4079_s8   ;;  %s5084_s14 = sld [smem:[#allocation26_spill]] }
 0x41b   : > { %p19_p2 = scmp.ge.s32.totalorder %s22_s8, 6   ;;  %s5085_s26 = sld [smem:[#allocation32_spill]] }
 0x41c   : > { %s5086_s27 = sld [smem:[#allocation27_spill]]  ;;  %s5087_s28 = sld [smem:[#allocation28_spill]] }
 0x41d   : > { %s5088_s29 = sld [smem:[#allocation29_spill]]  ;;  %s5089_s30 = sld [smem:[#allocation30_spill]] }
 0x41e   : > { %s5090_s24 = smov %s4055_s25  ;;  %21 = sbr.rel (!%p19_p2) target bundleno = 7 (0x7), region = 130 }
 0x420   : > { %s5091_s25 = smov %s5084_s14 }
 0x425   :  { %2563 = vsyncpa [#allocation7], 1 }
 0x426   :  { %2565 = vsyncpa [#allocation7 + $0x1], 1 }
 0x427   :  { %2566 = vsyncpa [#allocation10], 1 }
 0x428   :  { %2567 = vsyncpa [#allocation8], 1 }
 0x429   :  { %2569 = vsyncpa [#allocation8 + $0x1], 1 }
 0x42a   :  { %2570 = vsyncmov [#allocation3] }
 0x42d   :  { %s2571_s15 = vpop.sfrf %2570 }
 0x42e   :  { %p2836_p6 = scmp.ne.s32.totalorder %s2571_s15, 0 }
 0x430   :  { %2575 = shalt.err (%p2836_p6)  }
 0x431   :  { %2577 = vsyncmov [#allocation3 + $0x1] }
 0x434   :  { %s2578_s16 = vpop.sfrf %2577 }
 0x435   :  { %p2837_p8 = scmp.ne.s32.totalorder %s2578_s16, 0 }
 0x437   :  { %2582 = shalt.err (%p2837_p8)  }

</bundles_post_ra>
